<compile_context>
chip_gen: v7x
topology: tpu7x:2x2x1
jax: 0.10.0
libtpu: 0.0.40
codegen_flags: <defaults>
</compile_context>

<pallas_src>
import math
import functools

import jax
import jax.numpy as jnp
from jax.experimental import pallas as pl
from jax.experimental.pallas import tpu as pltpu


# ----------------------------------------------------------------------------
# Fused Pallas kernel: one batch tile per outer grid step, one encoder layer
# per inner grid step; activation carried in VMEM scratch across layers.
# ----------------------------------------------------------------------------
def _layernorm(y, gamma, beta, eps=1e-5):
    mu = jnp.mean(y, axis=-1, keepdims=True)
    var = jnp.mean((y - mu) ** 2, axis=-1, keepdims=True)
    return (y - mu) * jax.lax.rsqrt(var + eps) * gamma + beta


def fused_transformer_kernel(
    src_ref, pe_ref,
    wqkv_ref, bqkv_ref, wo_ref, bo_ref,
    g1_ref, be1_ref, w1_ref, b1_ref, w2_ref, b2_ref, g2_ref, be2_ref,
    fcw_ref, fcb_ref,
    o_ref,
    x_scr,
    *, num_heads,
):
    f32, bf16 = jnp.float32, jnp.bfloat16
    TB, S, D = src_ref.shape
    M = TB * S
    dh = D // num_heads
    l = pl.program_id(1)

    # ---- first layer step: add positional encoding (dropout = identity) ----
    @pl.when(l == 0)
    def _():
        x_scr[...] = (src_ref[...] + pe_ref[...]).reshape(M, D)

    x = x_scr[...]                                        # (M, D) f32
    xb = x.astype(bf16)

    # ---- fused QKV projection: one lane-dense (M,D)@(D,3D) matmul ----------
    # (1/sqrt(dh) already folded into the Q weight columns / bias wrapper-side)
    qkv = jnp.dot(xb, wqkv_ref[0], preferred_element_type=f32) + bqkv_ref[0]

    # ---- per-head attention (head axis only where the SxS matmul needs it) --
    ctx_heads = []
    for h in range(num_heads):                            # small static unroll
        qh = qkv[:, h * dh:(h + 1) * dh].reshape(TB, S, dh).astype(bf16)
        kh = qkv[:, D + h * dh:D + (h + 1) * dh].reshape(TB, S, dh).astype(bf16)
        vh = qkv[:, 2 * D + h * dh:2 * D + (h + 1) * dh].reshape(TB, S, dh).astype(bf16)

        s = jnp.einsum('bqe,bke->bqk', qh, kh,
                       preferred_element_type=f32)        # (TB,S,S)
        s = s - jnp.max(s, axis=-1, keepdims=True)
        p = jnp.exp(s)
        denom = jnp.sum(p, axis=-1, keepdims=True)        # (TB,S,1)

        ctx = jnp.einsum('bqk,bke->bqe', p.astype(bf16), vh,
                         preferred_element_type=f32)      # (TB,S,dh)
        # scale the small ctx (S*dh) instead of the big p (S*S); EUP reciprocal
        ctx = ctx * pl.reciprocal(denom, approx=True)
        ctx_heads.append(ctx.reshape(M, dh).astype(bf16))

    ctx_all = jnp.concatenate(ctx_heads, axis=-1)         # (M, D) bf16

    # ---- fused output projection: heads folded into the K dimension --------
    attn = jnp.dot(ctx_all, wo_ref[0], preferred_element_type=f32) + bo_ref[0]

    # residual + norm1 (dropout == identity)
    x1 = _layernorm(x + attn, g1_ref[0], be1_ref[0])

    # ---- position-wise feed forward ----------------------------------------
    h1 = jnp.dot(x1.astype(bf16), w1_ref[0], preferred_element_type=f32) + b1_ref[0]
    h1 = jnp.maximum(h1, 0.0)
    ff = jnp.dot(h1.astype(bf16), w2_ref[0], preferred_element_type=f32) + b2_ref[0]

    # residual + norm2
    x2 = _layernorm(x1 + ff, g2_ref[0], be2_ref[0])
    x_scr[...] = x2

    # ---- classifier head + exact softmax, only on the last layer step ------
    @pl.when(l == pl.num_programs(1) - 1)
    def _():
        logits = (jnp.dot(x2.astype(bf16), fcw_ref[...],
                          preferred_element_type=f32) + fcb_ref[...])  # (M,Cp)
        logits = logits - jnp.max(logits, axis=-1, keepdims=True)
        e = jnp.exp(logits)
        probs = e / jnp.sum(e, axis=-1, keepdims=True)     # exact: rows sum to 1
        o_ref[...] = probs.reshape(TB, S, o_ref.shape[-1])


# ----------------------------------------------------------------------------
# pallas_call wrapper
# ----------------------------------------------------------------------------
_PARAM_ORDER = ("wqkv", "bqkv", "wo", "bo", "g1", "be1",
                "w1", "b1", "w2", "b2", "g2", "be2")


def sequence_transformer_forward(src, pe, stacked, fc_w_pad, fc_b_pad,
                                 num_heads, num_layers, num_classes,
                                 batch_tile=None):
    """src: (B,S,D) f32; pe: (S,D) f32; stacked: dict of layer-stacked params."""
    B, S, D = src.shape
    c_pad = fc_w_pad.shape[1]
    d_ff = stacked["w1"].shape[-1]

    # Fold batch into the matmul M dimension: aim for TB*S >= 128 rows per step.
    if batch_tile is None:
        batch_tile = min(B, max(1, pl.cdiv(128, S)))
    TB = batch_tile
    assert B % TB == 0, "batch must be divisible by the batch tile"
    nb = B // TB

    weights = [stacked[n] for n in _PARAM_ORDER]

    def layer_spec(arr):
        # stream block l of the stacked (L, ...) weight each layer step
        nrest = arr.ndim - 1
        return pl.BlockSpec((1,) + arr.shape[1:],
                            lambda b, l, _n=nrest: (l,) + (0,) * _n)

    in_specs = [
        pl.BlockSpec((TB, S, D), lambda b, l: (b, 0, 0)),   # src batch tile
        pl.BlockSpec((S, D), lambda b, l: (0, 0)),          # positional enc.
    ]
    in_specs += [layer_spec(w) for w in weights]
    in_specs += [
        pl.BlockSpec(fc_w_pad.shape, lambda b, l: (0, 0)),
        pl.BlockSpec(fc_b_pad.shape, lambda b, l: (0, 0)),
    ]

    # advisory cost estimate (matmuls + attention + head)
    flops = int(2 * B * S * num_layers * (4 * D * D + 2 * D * d_ff)
                + 4 * B * S * S * D * num_layers
                + 2 * B * S * D * c_pad)
    transc = int(B * num_heads * S * S * num_layers + B * S * c_pad)
    bytes_acc = int(sum(int(w.size) * w.dtype.itemsize for w in weights)
                    + src.size * 4 + pe.size * 4
                    + fc_w_pad.size * 2 + fc_b_pad.size * 4
                    + B * S * c_pad * 4)

    out = pl.pallas_call(
        functools.partial(fused_transformer_kernel, num_heads=num_heads),
        out_shape=jax.ShapeDtypeStruct((B, S, c_pad), jnp.float32),
        grid=(nb, num_layers),
        in_specs=in_specs,
        out_specs=pl.BlockSpec((TB, S, c_pad), lambda b, l: (b, 0, 0)),
        scratch_shapes=[pltpu.VMEM((TB * S, D), jnp.float32)],
        compiler_params=pltpu.CompilerParams(
            dimension_semantics=("parallel", "arbitrary")),
        cost_estimate=pl.CostEstimate(flops=flops, transcendentals=transc,
                                      bytes_accessed=bytes_acc),
    )(src, pe, *weights, fc_w_pad, fc_b_pad)

    return out[..., :num_classes]


# ----------------------------------------------------------------------------
# Parameter construction (deterministic) + packing into kernel layout
# ----------------------------------------------------------------------------
def make_positional_encoding(max_len, d_model):
    pos = jnp.arange(max_len, dtype=jnp.float32)[:, None]
    div = jnp.exp(
        jnp.arange(0, d_model, 2, dtype=jnp.float32) * (-math.log(10000.0) / d_model)
    )
    pe = jnp.zeros((max_len, d_model), jnp.float32)
    pe = pe.at[:, 0::2].set(jnp.sin(pos * div))
    pe = pe.at[:, 1::2].set(jnp.cos(pos * div))
    return pe


def init_linear(key, fan_in, fan_out):
    kw, kb = jax.random.split(key)
    bound = 1.0 / math.sqrt(fan_in)
    w = jax.random.uniform(kw, (fan_in, fan_out), jnp.float32, -bound, bound)
    b = jax.random.uniform(kb, (1, fan_out), jnp.float32, -bound, bound)
    return w, b


def init_encoder_layer(key, d_model, d_ff):
    keys = jax.random.split(key, 6)
    p = {}
    p["wq"], p["bq"] = init_linear(keys[0], d_model, d_model)
    p["wk"], p["bk"] = init_linear(keys[1], d_model, d_model)
    p["wv"], p["bv"] = init_linear(keys[2], d_model, d_model)
    p["wo"], p["bo"] = init_linear(keys[3], d_model, d_model)
    p["w1"], p["b1"] = init_linear(keys[4], d_model, d_ff)
    p["w2"], p["b2"] = init_linear(keys[5], d_ff, d_model)
    # LayerNorm: PyTorch default init (weight=1, bias=0)
    p["g1"] = jnp.ones((1, d_model), jnp.float32)
    p["be1"] = jnp.zeros((1, d_model), jnp.float32)
    p["g2"] = jnp.ones((1, d_model), jnp.float32)
    p["be2"] = jnp.zeros((1, d_model), jnp.float32)
    return p


def pack_params(layer_params, num_heads):
    """Stack per-layer params (leading layer axis) and pack QKV.

    wq|wk|wv are fused into a single (L, D, 3D) bf16 tensor (one lane-dense
    matmul in the kernel); the 1/sqrt(dh) attention scale is folded into the Q
    columns and bias.  wo stays a plain (L, D, D) matrix (head reduction is the
    matmul's K dimension).  Biases / LN params stay f32 and lane-dense.
    """
    D = layer_params[0]["wq"].shape[0]
    dh = D // num_heads
    scale = 1.0 / math.sqrt(dh)

    def stackf(name):
        return jnp.stack([p[name] for p in layer_params], axis=0)

    wqkv = jnp.concatenate([stackf("wq") * scale, stackf("wk"), stackf("wv")],
                           axis=-1)                                 # (L,D,3D)
    bqkv = jnp.concatenate([stackf("bq") * scale, stackf("bk"), stackf("bv")],
                           axis=-1)                                 # (L,1,3D)

    out = {
        "wqkv": wqkv.astype(jnp.bfloat16),
        "bqkv": bqkv,                                   # f32
        "wo": stackf("wo").astype(jnp.bfloat16),        # (L,D,D)
        "bo": stackf("bo"),                             # (L,1,D)
        "w1": stackf("w1").astype(jnp.bfloat16),        # (L,D,d_ff)
        "b1": stackf("b1"),
        "w2": stackf("w2").astype(jnp.bfloat16),        # (L,d_ff,D)
        "b2": stackf("b2"),
        "g1": stackf("g1"), "be1": stackf("be1"),
        "g2": stackf("g2"), "be2": stackf("be2"),
    }
    return out


def pad_fc(fc_w, fc_b, c_pad):
    """Pad classifier to a lane-dense width; padded logits get -1e30 bias."""
    D, C = fc_w.shape
    w = jnp.zeros((D, c_pad), jnp.float32).at[:, :C].set(fc_w).astype(jnp.bfloat16)
    b = jnp.full((1, c_pad), -1e30, jnp.float32).at[:, :C].set(fc_b)
    return w, b


# ----------------------------------------------------------------------------
if __name__ == "__main__":
    # Hyper-parameters (small, consistent with the module)
    num_classes = 5
    d_model = 32
    num_heads = 4
    num_layers = 2
    d_ff = 64
    max_seq_length = 16
    batch = 2
    seq = 8

    key = jax.random.PRNGKey(0)
    k_src, k_fc, *k_layers = jax.random.split(key, 2 + num_layers)

    src = jax.random.normal(k_src, (batch, seq, d_model), jnp.float32)
    pe = make_positional_encoding(max_seq_length, d_model)
    layer_params = [init_encoder_layer(k, d_model, d_ff) for k in k_layers]
    fc_w, fc_b = init_linear(k_fc, d_model, num_classes)

    stacked = pack_params(layer_params, num_heads)
    c_pad = ((num_classes + 127) // 128) * 128          # lane-dense output width
    fc_w_pad, fc_b_pad = pad_fc(fc_w, fc_b, c_pad)

    out = sequence_transformer_forward(src, pe[:seq], stacked, fc_w_pad, fc_b_pad,
                                       num_heads, num_layers, num_classes)
    out = jax.block_until_ready(out)

    assert out.shape == (batch, seq, num_classes)
    # softmax rows must sum to 1 (final softmax uses exact divide)
    assert bool(jnp.allclose(jnp.sum(out, axis=-1), 1.0, atol=1e-5))
    print("KERNEL_OK")
</pallas_src>

<mosaic_0001>
module attributes {stable_mosaic.version = 11 : i64} {
  func.func @fused_transformer_kernel(%arg0: i32, %arg1: i32, %arg2: memref<2x8x32xf32, #tpu.memory_space<vmem>>, %arg3: memref<8x32xf32, #tpu.memory_space<vmem>>, %arg4: memref<1x32x96xbf16, #tpu.memory_space<vmem>>, %arg5: memref<1x1x96xf32, #tpu.memory_space<vmem>>, %arg6: memref<1x32x32xbf16, #tpu.memory_space<vmem>>, %arg7: memref<1x1x32xf32, #tpu.memory_space<vmem>>, %arg8: memref<1x1x32xf32, #tpu.memory_space<vmem>>, %arg9: memref<1x1x32xf32, #tpu.memory_space<vmem>>, %arg10: memref<1x32x64xbf16, #tpu.memory_space<vmem>>, %arg11: memref<1x1x64xf32, #tpu.memory_space<vmem>>, %arg12: memref<1x64x32xbf16, #tpu.memory_space<vmem>>, %arg13: memref<1x1x32xf32, #tpu.memory_space<vmem>>, %arg14: memref<1x1x32xf32, #tpu.memory_space<vmem>>, %arg15: memref<1x1x32xf32, #tpu.memory_space<vmem>>, %arg16: memref<32x128xbf16, #tpu.memory_space<vmem>>, %arg17: memref<1x128xf32, #tpu.memory_space<vmem>>, %arg18: memref<2x8x128xf32, #tpu.memory_space<vmem>>, %arg19: memref<16x32xf32, #tpu.memory_space<vmem>>) attributes {dimension_semantics = [#tpu.dimension_semantics<parallel>, #tpu.dimension_semantics<arbitrary>], iteration_bounds = array<i64: 1, 2>, scalar_prefetch = 0 : i64, scratch_operands = 1 : i64, tpu.core_type = #tpu.core_type<tc>, window_params = [{transform_indices = @transform_0, window_bounds = array<i64: 2, 8, 32>}, {pipeline_mode = #tpu.pipeline_mode<synchronous>, transform_indices = @transform_1, window_bounds = array<i64: 8, 32>}, {transform_indices = @transform_2, window_bounds = array<i64: 1, 32, 96>}, {transform_indices = @transform_3, window_bounds = array<i64: 1, 1, 96>}, {transform_indices = @transform_4, window_bounds = array<i64: 1, 32, 32>}, {transform_indices = @transform_5, window_bounds = array<i64: 1, 1, 32>}, {transform_indices = @transform_6, window_bounds = array<i64: 1, 1, 32>}, {transform_indices = @transform_7, window_bounds = array<i64: 1, 1, 32>}, {transform_indices = @transform_8, window_bounds = array<i64: 1, 32, 64>}, {transform_indices = @transform_9, window_bounds = array<i64: 1, 1, 64>}, {transform_indices = @transform_10, window_bounds = array<i64: 1, 64, 32>}, {transform_indices = @transform_11, window_bounds = array<i64: 1, 1, 32>}, {transform_indices = @transform_12, window_bounds = array<i64: 1, 1, 32>}, {transform_indices = @transform_13, window_bounds = array<i64: 1, 1, 32>}, {pipeline_mode = #tpu.pipeline_mode<synchronous>, transform_indices = @transform_14, window_bounds = array<i64: 32, 128>}, {pipeline_mode = #tpu.pipeline_mode<synchronous>, transform_indices = @transform_15, window_bounds = array<i64: 1, 128>}, {transform_indices = @transform_16, window_bounds = array<i64: 2, 8, 128>}]} {
    %c0_i32 = arith.constant 0 : i32
    %0 = arith.cmpi eq, %arg1, %c0_i32 : i32
    %1 = arith.extui %0 : i1 to i32
    %c0_i32_0 = arith.constant 0 : i32
    %2 = arith.cmpi ne, %1, %c0_i32_0 : i32
    scf.if %2 {
      %c0_71 = arith.constant 0 : index
      %c0_72 = arith.constant 0 : index
      %c0_73 = arith.constant 0 : index
      %192 = vector.load %arg2[%c0_71, %c0_72, %c0_73] : memref<2x8x32xf32, #tpu.memory_space<vmem>>, vector<2x8x32xf32>
      %c0_74 = arith.constant 0 : index
      %c0_75 = arith.constant 0 : index
      %193 = vector.load %arg3[%c0_74, %c0_75] : memref<8x32xf32, #tpu.memory_space<vmem>>, vector<8x32xf32>
      %194 = vector.shape_cast %193 : vector<8x32xf32> to vector<1x8x32xf32>
      %195 = vector.broadcast %194 : vector<1x8x32xf32> to vector<2x8x32xf32>
      %196 = arith.addf %192, %195 : vector<2x8x32xf32>
      %197 = vector.shape_cast %196 : vector<2x8x32xf32> to vector<16x32xf32>
      %c0_76 = arith.constant 0 : index
      %c0_77 = arith.constant 0 : index
      %198 = vector.load %arg19[%c0_76, %c0_77] : memref<16x32xf32, #tpu.memory_space<vmem>>, vector<16x32xf32>
      tpu.vector_store %arg19[%c0_76, %c0_77], %197 {strides = array<i32>} : memref<16x32xf32, #tpu.memory_space<vmem>>, vector<16x32xf32>,
    } else {
    }
    %c0 = arith.constant 0 : index
    %c0_1 = arith.constant 0 : index
    %3 = vector.load %arg19[%c0, %c0_1] : memref<16x32xf32, #tpu.memory_space<vmem>>, vector<16x32xf32>
    %4 = arith.truncf %3 : vector<16x32xf32> to vector<16x32xbf16>
    %c0_2 = arith.constant 0 : index
    %c0_3 = arith.constant 0 : index
    %c0_4 = arith.constant 0 : index
    %5 = vector.load %arg4[%c0_2, %c0_3, %c0_4] : memref<1x32x96xbf16, #tpu.memory_space<vmem>>, vector<1x32x96xbf16>
    %6 = vector.shape_cast %5 : vector<1x32x96xbf16> to vector<32x96xbf16>
    %cst = arith.constant dense<0.000000e+00> : vector<16x96xf32>
    %7 = tpu.matmul %4, %6, %cst {dimension_numbers = #tpu.dot_dimension_numbers<[1], [0], [0], [1], [0, 0, 1, 1], [], []>} : vector<16x32xbf16>, vector<32x96xbf16>, vector<16x96xf32> -> vector<16x96xf32>
    %c0_5 = arith.constant 0 : index
    %c0_6 = arith.constant 0 : index
    %c0_7 = arith.constant 0 : index
    %8 = vector.load %arg5[%c0_5, %c0_6, %c0_7] : memref<1x1x96xf32, #tpu.memory_space<vmem>>, vector<1x1x96xf32>
    %9 = vector.shape_cast %8 : vector<1x1x96xf32> to vector<1x96xf32>
    %10 = vector.broadcast %9 : vector<1x96xf32> to vector<16x96xf32>
    %11 = arith.addf %7, %10 : vector<16x96xf32>
    %12 = vector.extract_strided_slice %11 {offsets = [0, 0], sizes = [16, 8], strides = [1, 1]} : vector<16x96xf32> to vector<16x8xf32>
    %13 = vector.shape_cast %12 : vector<16x8xf32> to vector<2x8x8xf32>
    %14 = arith.truncf %13 : vector<2x8x8xf32> to vector<2x8x8xbf16>
    %15 = vector.extract_strided_slice %11 {offsets = [0, 32], sizes = [16, 8], strides = [1, 1]} : vector<16x96xf32> to vector<16x8xf32>
    %16 = vector.shape_cast %15 : vector<16x8xf32> to vector<2x8x8xf32>
    %17 = arith.truncf %16 : vector<2x8x8xf32> to vector<2x8x8xbf16>
    %18 = vector.extract_strided_slice %11 {offsets = [0, 64], sizes = [16, 8], strides = [1, 1]} : vector<16x96xf32> to vector<16x8xf32>
    %19 = vector.shape_cast %18 : vector<16x8xf32> to vector<2x8x8xf32>
    %20 = arith.truncf %19 : vector<2x8x8xf32> to vector<2x8x8xbf16>
    "tpu.trace_start"() <{level = 10 : i32, message = "bqe,bke->bqk"}> : () -> ()
    %cst_8 = arith.constant dense<0.000000e+00> : vector<2x8x8xf32>
    %21 = tpu.matmul %14, %17, %cst_8 {dimension_numbers = #tpu.dot_dimension_numbers<[2], [2], [1], [1], [0, 0, 0, 1, 1, 1], [0], [0]>} : vector<2x8x8xbf16>, vector<2x8x8xbf16>, vector<2x8x8xf32> -> vector<2x8x8xf32>
    "tpu.trace_stop"() : () -> ()
    %cst_9 = arith.constant dense<0xFF800000> : vector<2x8xf32>
    %22 = vector.multi_reduction <maximumf>, %21, %cst_9 [2] : vector<2x8x8xf32> to vector<2x8xf32>
    %23 = vector.shape_cast %22 : vector<2x8xf32> to vector<2x8x1xf32>
    %24 = vector.broadcast %23 : vector<2x8x1xf32> to vector<2x8x8xf32>
    %25 = arith.subf %21, %24 : vector<2x8x8xf32>
    %26 = math.exp %25 : vector<2x8x8xf32>
    %cst_10 = arith.constant dense<0.000000e+00> : vector<2x8xf32>
    %27 = vector.multi_reduction <add>, %26, %cst_10 [2] : vector<2x8x8xf32> to vector<2x8xf32>
    %28 = vector.shape_cast %27 : vector<2x8xf32> to vector<2x8x1xf32>
    %29 = arith.truncf %26 : vector<2x8x8xf32> to vector<2x8x8xbf16>
    "tpu.trace_start"() <{level = 10 : i32, message = "bqk,bke->bqe"}> : () -> ()
    %cst_11 = arith.constant dense<0.000000e+00> : vector<2x8x8xf32>
    %30 = tpu.matmul %29, %20, %cst_11 {dimension_numbers = #tpu.dot_dimension_numbers<[2], [1], [1], [2], [0, 0, 0, 1, 1, 2], [0], [0]>} : vector<2x8x8xbf16>, vector<2x8x8xbf16>, vector<2x8x8xf32> -> vector<2x8x8xf32>
    "tpu.trace_stop"() : () -> ()
    %31 = tpu.reciprocal %28 {approx = true} : vector<2x8x1xf32> -> vector<2x8x1xf32>
    %32 = vector.broadcast %31 : vector<2x8x1xf32> to vector<2x8x8xf32>
    %33 = arith.mulf %30, %32 : vector<2x8x8xf32>
    %34 = vector.shape_cast %33 : vector<2x8x8xf32> to vector<16x8xf32>
    %35 = arith.truncf %34 : vector<16x8xf32> to vector<16x8xbf16>
    %36 = vector.extract_strided_slice %11 {offsets = [0, 8], sizes = [16, 8], strides = [1, 1]} : vector<16x96xf32> to vector<16x8xf32>
    %37 = vector.shape_cast %36 : vector<16x8xf32> to vector<2x8x8xf32>
    %38 = arith.truncf %37 : vector<2x8x8xf32> to vector<2x8x8xbf16>
    %39 = vector.extract_strided_slice %11 {offsets = [0, 40], sizes = [16, 8], strides = [1, 1]} : vector<16x96xf32> to vector<16x8xf32>
    %40 = vector.shape_cast %39 : vector<16x8xf32> to vector<2x8x8xf32>
    %41 = arith.truncf %40 : vector<2x8x8xf32> to vector<2x8x8xbf16>
    %42 = vector.extract_strided_slice %11 {offsets = [0, 72], sizes = [16, 8], strides = [1, 1]} : vector<16x96xf32> to vector<16x8xf32>
    %43 = vector.shape_cast %42 : vector<16x8xf32> to vector<2x8x8xf32>
    %44 = arith.truncf %43 : vector<2x8x8xf32> to vector<2x8x8xbf16>
    "tpu.trace_start"() <{level = 10 : i32, message = "bqe,bke->bqk"}> : () -> ()
    %cst_12 = arith.constant dense<0.000000e+00> : vector<2x8x8xf32>
    %45 = tpu.matmul %38, %41, %cst_12 {dimension_numbers = #tpu.dot_dimension_numbers<[2], [2], [1], [1], [0, 0, 0, 1, 1, 1], [0], [0]>} : vector<2x8x8xbf16>, vector<2x8x8xbf16>, vector<2x8x8xf32> -> vector<2x8x8xf32>
    "tpu.trace_stop"() : () -> ()
    %cst_13 = arith.constant dense<0xFF800000> : vector<2x8xf32>
    %46 = vector.multi_reduction <maximumf>, %45, %cst_13 [2] : vector<2x8x8xf32> to vector<2x8xf32>
    %47 = vector.shape_cast %46 : vector<2x8xf32> to vector<2x8x1xf32>
    %48 = vector.broadcast %47 : vector<2x8x1xf32> to vector<2x8x8xf32>
    %49 = arith.subf %45, %48 : vector<2x8x8xf32>
    %50 = math.exp %49 : vector<2x8x8xf32>
    %cst_14 = arith.constant dense<0.000000e+00> : vector<2x8xf32>
    %51 = vector.multi_reduction <add>, %50, %cst_14 [2] : vector<2x8x8xf32> to vector<2x8xf32>
    %52 = vector.shape_cast %51 : vector<2x8xf32> to vector<2x8x1xf32>
    %53 = arith.truncf %50 : vector<2x8x8xf32> to vector<2x8x8xbf16>
    "tpu.trace_start"() <{level = 10 : i32, message = "bqk,bke->bqe"}> : () -> ()
    %cst_15 = arith.constant dense<0.000000e+00> : vector<2x8x8xf32>
    %54 = tpu.matmul %53, %44, %cst_15 {dimension_numbers = #tpu.dot_dimension_numbers<[2], [1], [1], [2], [0, 0, 0, 1, 1, 2], [0], [0]>} : vector<2x8x8xbf16>, vector<2x8x8xbf16>, vector<2x8x8xf32> -> vector<2x8x8xf32>
    "tpu.trace_stop"() : () -> ()
    %55 = tpu.reciprocal %52 {approx = true} : vector<2x8x1xf32> -> vector<2x8x1xf32>
    %56 = vector.broadcast %55 : vector<2x8x1xf32> to vector<2x8x8xf32>
    %57 = arith.mulf %54, %56 : vector<2x8x8xf32>
    %58 = vector.shape_cast %57 : vector<2x8x8xf32> to vector<16x8xf32>
    %59 = arith.truncf %58 : vector<16x8xf32> to vector<16x8xbf16>
    %60 = vector.extract_strided_slice %11 {offsets = [0, 16], sizes = [16, 8], strides = [1, 1]} : vector<16x96xf32> to vector<16x8xf32>
    %61 = vector.shape_cast %60 : vector<16x8xf32> to vector<2x8x8xf32>
    %62 = arith.truncf %61 : vector<2x8x8xf32> to vector<2x8x8xbf16>
    %63 = vector.extract_strided_slice %11 {offsets = [0, 48], sizes = [16, 8], strides = [1, 1]} : vector<16x96xf32> to vector<16x8xf32>
    %64 = vector.shape_cast %63 : vector<16x8xf32> to vector<2x8x8xf32>
    %65 = arith.truncf %64 : vector<2x8x8xf32> to vector<2x8x8xbf16>
    %66 = vector.extract_strided_slice %11 {offsets = [0, 80], sizes = [16, 8], strides = [1, 1]} : vector<16x96xf32> to vector<16x8xf32>
    %67 = vector.shape_cast %66 : vector<16x8xf32> to vector<2x8x8xf32>
    %68 = arith.truncf %67 : vector<2x8x8xf32> to vector<2x8x8xbf16>
    "tpu.trace_start"() <{level = 10 : i32, message = "bqe,bke->bqk"}> : () -> ()
    %cst_16 = arith.constant dense<0.000000e+00> : vector<2x8x8xf32>
    %69 = tpu.matmul %62, %65, %cst_16 {dimension_numbers = #tpu.dot_dimension_numbers<[2], [2], [1], [1], [0, 0, 0, 1, 1, 1], [0], [0]>} : vector<2x8x8xbf16>, vector<2x8x8xbf16>, vector<2x8x8xf32> -> vector<2x8x8xf32>
    "tpu.trace_stop"() : () -> ()
    %cst_17 = arith.constant dense<0xFF800000> : vector<2x8xf32>
    %70 = vector.multi_reduction <maximumf>, %69, %cst_17 [2] : vector<2x8x8xf32> to vector<2x8xf32>
    %71 = vector.shape_cast %70 : vector<2x8xf32> to vector<2x8x1xf32>
    %72 = vector.broadcast %71 : vector<2x8x1xf32> to vector<2x8x8xf32>
    %73 = arith.subf %69, %72 : vector<2x8x8xf32>
    %74 = math.exp %73 : vector<2x8x8xf32>
    %cst_18 = arith.constant dense<0.000000e+00> : vector<2x8xf32>
    %75 = vector.multi_reduction <add>, %74, %cst_18 [2] : vector<2x8x8xf32> to vector<2x8xf32>
    %76 = vector.shape_cast %75 : vector<2x8xf32> to vector<2x8x1xf32>
    %77 = arith.truncf %74 : vector<2x8x8xf32> to vector<2x8x8xbf16>
    "tpu.trace_start"() <{level = 10 : i32, message = "bqk,bke->bqe"}> : () -> ()
    %cst_19 = arith.constant dense<0.000000e+00> : vector<2x8x8xf32>
    %78 = tpu.matmul %77, %68, %cst_19 {dimension_numbers = #tpu.dot_dimension_numbers<[2], [1], [1], [2], [0, 0, 0, 1, 1, 2], [0], [0]>} : vector<2x8x8xbf16>, vector<2x8x8xbf16>, vector<2x8x8xf32> -> vector<2x8x8xf32>
    "tpu.trace_stop"() : () -> ()
    %79 = tpu.reciprocal %76 {approx = true} : vector<2x8x1xf32> -> vector<2x8x1xf32>
    %80 = vector.broadcast %79 : vector<2x8x1xf32> to vector<2x8x8xf32>
    %81 = arith.mulf %78, %80 : vector<2x8x8xf32>
    %82 = vector.shape_cast %81 : vector<2x8x8xf32> to vector<16x8xf32>
    %83 = arith.truncf %82 : vector<16x8xf32> to vector<16x8xbf16>
    %84 = vector.extract_strided_slice %11 {offsets = [0, 24], sizes = [16, 8], strides = [1, 1]} : vector<16x96xf32> to vector<16x8xf32>
    %85 = vector.shape_cast %84 : vector<16x8xf32> to vector<2x8x8xf32>
    %86 = arith.truncf %85 : vector<2x8x8xf32> to vector<2x8x8xbf16>
    %87 = vector.extract_strided_slice %11 {offsets = [0, 56], sizes = [16, 8], strides = [1, 1]} : vector<16x96xf32> to vector<16x8xf32>
    %88 = vector.shape_cast %87 : vector<16x8xf32> to vector<2x8x8xf32>
    %89 = arith.truncf %88 : vector<2x8x8xf32> to vector<2x8x8xbf16>
    %90 = vector.extract_strided_slice %11 {offsets = [0, 88], sizes = [16, 8], strides = [1, 1]} : vector<16x96xf32> to vector<16x8xf32>
    %91 = vector.shape_cast %90 : vector<16x8xf32> to vector<2x8x8xf32>
    %92 = arith.truncf %91 : vector<2x8x8xf32> to vector<2x8x8xbf16>
    "tpu.trace_start"() <{level = 10 : i32, message = "bqe,bke->bqk"}> : () -> ()
    %cst_20 = arith.constant dense<0.000000e+00> : vector<2x8x8xf32>
    %93 = tpu.matmul %86, %89, %cst_20 {dimension_numbers = #tpu.dot_dimension_numbers<[2], [2], [1], [1], [0, 0, 0, 1, 1, 1], [0], [0]>} : vector<2x8x8xbf16>, vector<2x8x8xbf16>, vector<2x8x8xf32> -> vector<2x8x8xf32>
    "tpu.trace_stop"() : () -> ()
    %cst_21 = arith.constant dense<0xFF800000> : vector<2x8xf32>
    %94 = vector.multi_reduction <maximumf>, %93, %cst_21 [2] : vector<2x8x8xf32> to vector<2x8xf32>
    %95 = vector.shape_cast %94 : vector<2x8xf32> to vector<2x8x1xf32>
    %96 = vector.broadcast %95 : vector<2x8x1xf32> to vector<2x8x8xf32>
    %97 = arith.subf %93, %96 : vector<2x8x8xf32>
    %98 = math.exp %97 : vector<2x8x8xf32>
    %cst_22 = arith.constant dense<0.000000e+00> : vector<2x8xf32>
    %99 = vector.multi_reduction <add>, %98, %cst_22 [2] : vector<2x8x8xf32> to vector<2x8xf32>
    %100 = vector.shape_cast %99 : vector<2x8xf32> to vector<2x8x1xf32>
    %101 = arith.truncf %98 : vector<2x8x8xf32> to vector<2x8x8xbf16>
    "tpu.trace_start"() <{level = 10 : i32, message = "bqk,bke->bqe"}> : () -> ()
    %cst_23 = arith.constant dense<0.000000e+00> : vector<2x8x8xf32>
    %102 = tpu.matmul %101, %92, %cst_23 {dimension_numbers = #tpu.dot_dimension_numbers<[2], [1], [1], [2], [0, 0, 0, 1, 1, 2], [0], [0]>} : vector<2x8x8xbf16>, vector<2x8x8xbf16>, vector<2x8x8xf32> -> vector<2x8x8xf32>
    "tpu.trace_stop"() : () -> ()
    %103 = tpu.reciprocal %100 {approx = true} : vector<2x8x1xf32> -> vector<2x8x1xf32>
    %104 = vector.broadcast %103 : vector<2x8x1xf32> to vector<2x8x8xf32>
    %105 = arith.mulf %102, %104 : vector<2x8x8xf32>
    %106 = vector.shape_cast %105 : vector<2x8x8xf32> to vector<16x8xf32>
    %107 = arith.truncf %106 : vector<16x8xf32> to vector<16x8xbf16>
    %108 = tpu.concatenate %35, %59, %83, %107 in 1 : vector<16x8xbf16>, vector<16x8xbf16>, vector<16x8xbf16>, vector<16x8xbf16> -> vector<16x32xbf16>
    %c0_24 = arith.constant 0 : index
    %c0_25 = arith.constant 0 : index
    %c0_26 = arith.constant 0 : index
    %109 = vector.load %arg6[%c0_24, %c0_25, %c0_26] : memref<1x32x32xbf16, #tpu.memory_space<vmem>>, vector<1x32x32xbf16>
    %110 = vector.shape_cast %109 : vector<1x32x32xbf16> to vector<32x32xbf16>
    %cst_27 = arith.constant dense<0.000000e+00> : vector<16x32xf32>
    %111 = tpu.matmul %108, %110, %cst_27 {dimension_numbers = #tpu.dot_dimension_numbers<[1], [0], [0], [1], [0, 0, 1, 1], [], []>} : vector<16x32xbf16>, vector<32x32xbf16>, vector<16x32xf32> -> vector<16x32xf32>
    %c0_28 = arith.constant 0 : index
    %c0_29 = arith.constant 0 : index
    %c0_30 = arith.constant 0 : index
    %112 = vector.load %arg7[%c0_28, %c0_29, %c0_30] : memref<1x1x32xf32, #tpu.memory_space<vmem>>, vector<1x1x32xf32>
    %113 = vector.shape_cast %112 : vector<1x1x32xf32> to vector<1x32xf32>
    %114 = vector.broadcast %113 : vector<1x32xf32> to vector<16x32xf32>
    %115 = arith.addf %111, %114 : vector<16x32xf32>
    %116 = arith.addf %3, %115 : vector<16x32xf32>
    %c0_31 = arith.constant 0 : index
    %c0_32 = arith.constant 0 : index
    %c0_33 = arith.constant 0 : index
    %117 = vector.load %arg8[%c0_31, %c0_32, %c0_33] : memref<1x1x32xf32, #tpu.memory_space<vmem>>, vector<1x1x32xf32>
    %118 = vector.shape_cast %117 : vector<1x1x32xf32> to vector<1x32xf32>
    %c0_34 = arith.constant 0 : index
    %c0_35 = arith.constant 0 : index
    %c0_36 = arith.constant 0 : index
    %119 = vector.load %arg9[%c0_34, %c0_35, %c0_36] : memref<1x1x32xf32, #tpu.memory_space<vmem>>, vector<1x1x32xf32>
    %120 = vector.shape_cast %119 : vector<1x1x32xf32> to vector<1x32xf32>
    %cst_37 = arith.constant dense<0.000000e+00> : vector<16xf32>
    %121 = vector.multi_reduction <add>, %116, %cst_37 [1] : vector<16x32xf32> to vector<16xf32>
    %122 = vector.shape_cast %121 : vector<16xf32> to vector<16x1xf32>
    %cst_38 = arith.constant 3.200000e+01 : f32
    %123 = vector.broadcast %cst_38 : f32 to vector<16x1xf32>
    %124 = arith.divf %122, %123 : vector<16x1xf32>
    %125 = vector.broadcast %124 : vector<16x1xf32> to vector<16x32xf32>
    %126 = arith.subf %116, %125 : vector<16x32xf32>
    %127 = arith.mulf %126, %126 : vector<16x32xf32>
    %cst_39 = arith.constant dense<0.000000e+00> : vector<16xf32>
    %128 = vector.multi_reduction <add>, %127, %cst_39 [1] : vector<16x32xf32> to vector<16xf32>
    %129 = vector.shape_cast %128 : vector<16xf32> to vector<16x1xf32>
    %cst_40 = arith.constant 3.200000e+01 : f32
    %130 = vector.broadcast %cst_40 : f32 to vector<16x1xf32>
    %131 = arith.divf %129, %130 : vector<16x1xf32>
    %132 = vector.broadcast %124 : vector<16x1xf32> to vector<16x32xf32>
    %133 = arith.subf %116, %132 : vector<16x32xf32>
    %cst_41 = arith.constant 9.99999974E-6 : f32
    %134 = vector.broadcast %cst_41 : f32 to vector<16x1xf32>
    %135 = arith.addf %131, %134 : vector<16x1xf32>
    %136 = math.rsqrt %135 : vector<16x1xf32>
    %137 = vector.broadcast %136 : vector<16x1xf32> to vector<16x32xf32>
    %138 = arith.mulf %133, %137 : vector<16x32xf32>
    %139 = vector.broadcast %118 : vector<1x32xf32> to vector<16x32xf32>
    %140 = arith.mulf %138, %139 : vector<16x32xf32>
    %141 = vector.broadcast %120 : vector<1x32xf32> to vector<16x32xf32>
    %142 = arith.addf %140, %141 : vector<16x32xf32>
    %143 = arith.truncf %142 : vector<16x32xf32> to vector<16x32xbf16>
    %c0_42 = arith.constant 0 : index
    %c0_43 = arith.constant 0 : index
    %c0_44 = arith.constant 0 : index
    %144 = vector.load %arg10[%c0_42, %c0_43, %c0_44] : memref<1x32x64xbf16, #tpu.memory_space<vmem>>, vector<1x32x64xbf16>
    %145 = vector.shape_cast %144 : vector<1x32x64xbf16> to vector<32x64xbf16>
    %cst_45 = arith.constant dense<0.000000e+00> : vector<16x64xf32>
    %146 = tpu.matmul %143, %145, %cst_45 {dimension_numbers = #tpu.dot_dimension_numbers<[1], [0], [0], [1], [0, 0, 1, 1], [], []>} : vector<16x32xbf16>, vector<32x64xbf16>, vector<16x64xf32> -> vector<16x64xf32>
    %c0_46 = arith.constant 0 : index
    %c0_47 = arith.constant 0 : index
    %c0_48 = arith.constant 0 : index
    %147 = vector.load %arg11[%c0_46, %c0_47, %c0_48] : memref<1x1x64xf32, #tpu.memory_space<vmem>>, vector<1x1x64xf32>
    %148 = vector.shape_cast %147 : vector<1x1x64xf32> to vector<1x64xf32>
    %149 = vector.broadcast %148 : vector<1x64xf32> to vector<16x64xf32>
    %150 = arith.addf %146, %149 : vector<16x64xf32>
    %cst_49 = arith.constant 0.000000e+00 : f32
    %151 = vector.broadcast %cst_49 : f32 to vector<16x64xf32>
    %152 = arith.maximumf %150, %151 : vector<16x64xf32>
    %153 = arith.truncf %152 : vector<16x64xf32> to vector<16x64xbf16>
    %c0_50 = arith.constant 0 : index
    %c0_51 = arith.constant 0 : index
    %c0_52 = arith.constant 0 : index
    %154 = vector.load %arg12[%c0_50, %c0_51, %c0_52] : memref<1x64x32xbf16, #tpu.memory_space<vmem>>, vector<1x64x32xbf16>
    %155 = vector.shape_cast %154 : vector<1x64x32xbf16> to vector<64x32xbf16>
    %cst_53 = arith.constant dense<0.000000e+00> : vector<16x32xf32>
    %156 = tpu.matmul %153, %155, %cst_53 {dimension_numbers = #tpu.dot_dimension_numbers<[1], [0], [0], [1], [0, 0, 1, 1], [], []>} : vector<16x64xbf16>, vector<64x32xbf16>, vector<16x32xf32> -> vector<16x32xf32>
    %c0_54 = arith.constant 0 : index
    %c0_55 = arith.constant 0 : index
    %c0_56 = arith.constant 0 : index
    %157 = vector.load %arg13[%c0_54, %c0_55, %c0_56] : memref<1x1x32xf32, #tpu.memory_space<vmem>>, vector<1x1x32xf32>
    %158 = vector.shape_cast %157 : vector<1x1x32xf32> to vector<1x32xf32>
    %159 = vector.broadcast %158 : vector<1x32xf32> to vector<16x32xf32>
    %160 = arith.addf %156, %159 : vector<16x32xf32>
    %161 = arith.addf %142, %160 : vector<16x32xf32>
    %c0_57 = arith.constant 0 : index
    %c0_58 = arith.constant 0 : index
    %c0_59 = arith.constant 0 : index
    %162 = vector.load %arg14[%c0_57, %c0_58, %c0_59] : memref<1x1x32xf32, #tpu.memory_space<vmem>>, vector<1x1x32xf32>
    %163 = vector.shape_cast %162 : vector<1x1x32xf32> to vector<1x32xf32>
    %c0_60 = arith.constant 0 : index
    %c0_61 = arith.constant 0 : index
    %c0_62 = arith.constant 0 : index
    %164 = vector.load %arg15[%c0_60, %c0_61, %c0_62] : memref<1x1x32xf32, #tpu.memory_space<vmem>>, vector<1x1x32xf32>
    %165 = vector.shape_cast %164 : vector<1x1x32xf32> to vector<1x32xf32>
    %cst_63 = arith.constant dense<0.000000e+00> : vector<16xf32>
    %166 = vector.multi_reduction <add>, %161, %cst_63 [1] : vector<16x32xf32> to vector<16xf32>
    %167 = vector.shape_cast %166 : vector<16xf32> to vector<16x1xf32>
    %cst_64 = arith.constant 3.200000e+01 : f32
    %168 = vector.broadcast %cst_64 : f32 to vector<16x1xf32>
    %169 = arith.divf %167, %168 : vector<16x1xf32>
    %170 = vector.broadcast %169 : vector<16x1xf32> to vector<16x32xf32>
    %171 = arith.subf %161, %170 : vector<16x32xf32>
    %172 = arith.mulf %171, %171 : vector<16x32xf32>
    %cst_65 = arith.constant dense<0.000000e+00> : vector<16xf32>
    %173 = vector.multi_reduction <add>, %172, %cst_65 [1] : vector<16x32xf32> to vector<16xf32>
    %174 = vector.shape_cast %173 : vector<16xf32> to vector<16x1xf32>
    %cst_66 = arith.constant 3.200000e+01 : f32
    %175 = vector.broadcast %cst_66 : f32 to vector<16x1xf32>
    %176 = arith.divf %174, %175 : vector<16x1xf32>
    %177 = vector.broadcast %169 : vector<16x1xf32> to vector<16x32xf32>
    %178 = arith.subf %161, %177 : vector<16x32xf32>
    %cst_67 = arith.constant 9.99999974E-6 : f32
    %179 = vector.broadcast %cst_67 : f32 to vector<16x1xf32>
    %180 = arith.addf %176, %179 : vector<16x1xf32>
    %181 = math.rsqrt %180 : vector<16x1xf32>
    %182 = vector.broadcast %181 : vector<16x1xf32> to vector<16x32xf32>
    %183 = arith.mulf %178, %182 : vector<16x32xf32>
    %184 = vector.broadcast %163 : vector<1x32xf32> to vector<16x32xf32>
    %185 = arith.mulf %183, %184 : vector<16x32xf32>
    %186 = vector.broadcast %165 : vector<1x32xf32> to vector<16x32xf32>
    %187 = arith.addf %185, %186 : vector<16x32xf32>
    %c0_68 = arith.constant 0 : index
    %c0_69 = arith.constant 0 : index
    %188 = vector.load %arg19[%c0_68, %c0_69] : memref<16x32xf32, #tpu.memory_space<vmem>>, vector<16x32xf32>
    tpu.vector_store %arg19[%c0_68, %c0_69], %187 {strides = array<i32>} : memref<16x32xf32, #tpu.memory_space<vmem>>, vector<16x32xf32>,
    %c1_i32 = arith.constant 1 : i32
    %189 = arith.cmpi eq, %arg1, %c1_i32 : i32
    %190 = arith.extui %189 : i1 to i32
    %c0_i32_70 = arith.constant 0 : i32
    %191 = arith.cmpi ne, %190, %c0_i32_70 : i32
    scf.if %191 {
      %192 = arith.truncf %187 : vector<16x32xf32> to vector<16x32xbf16>
      %c0_71 = arith.constant 0 : index
      %c0_72 = arith.constant 0 : index
      %193 = vector.load %arg16[%c0_71, %c0_72] : memref<32x128xbf16, #tpu.memory_space<vmem>>, vector<32x128xbf16>
      %cst_73 = arith.constant dense<0.000000e+00> : vector<16x128xf32>
      %194 = tpu.matmul %192, %193, %cst_73 {dimension_numbers = #tpu.dot_dimension_numbers<[1], [0], [0], [1], [0, 0, 1, 1], [], []>} : vector<16x32xbf16>, vector<32x128xbf16>, vector<16x128xf32> -> vector<16x128xf32>
      %c0_74 = arith.constant 0 : index
      %c0_75 = arith.constant 0 : index
      %195 = vector.load %arg17[%c0_74, %c0_75] : memref<1x128xf32, #tpu.memory_space<vmem>>, vector<1x128xf32>
      %196 = vector.broadcast %195 : vector<1x128xf32> to vector<16x128xf32>
      %197 = arith.addf %194, %196 : vector<16x128xf32>
      %cst_76 = arith.constant dense<0xFF800000> : vector<16xf32>
      %198 = vector.multi_reduction <maximumf>, %197, %cst_76 [1] : vector<16x128xf32> to vector<16xf32>
      %199 = vector.shape_cast %198 : vector<16xf32> to vector<16x1xf32>
      %200 = vector.broadcast %199 : vector<16x1xf32> to vector<16x128xf32>
      %201 = arith.subf %197, %200 : vector<16x128xf32>
      %202 = math.exp %201 : vector<16x128xf32>
      %cst_77 = arith.constant dense<0.000000e+00> : vector<16xf32>
      %203 = vector.multi_reduction <add>, %202, %cst_77 [1] : vector<16x128xf32> to vector<16xf32>
      %204 = vector.shape_cast %203 : vector<16xf32> to vector<16x1xf32>
      %205 = vector.broadcast %204 : vector<16x1xf32> to vector<16x128xf32>
      %206 = arith.divf %202, %205 : vector<16x128xf32>
      %207 = vector.shape_cast %206 : vector<16x128xf32> to vector<2x8x128xf32>
      %c0_78 = arith.constant 0 : index
      %c0_79 = arith.constant 0 : index
      %c0_80 = arith.constant 0 : index
      %208 = vector.load %arg18[%c0_78, %c0_79, %c0_80] : memref<2x8x128xf32, #tpu.memory_space<vmem>>, vector<2x8x128xf32>
      tpu.vector_store %arg18[%c0_78, %c0_79, %c0_80], %207 {strides = array<i32>} : memref<2x8x128xf32, #tpu.memory_space<vmem>>, vector<2x8x128xf32>,
    } else {
    }
    return
  }
  func.func @transform_0(%arg0: i32, %arg1: i32) -> (i32, i32, i32) {
    %c0_i32 = arith.constant 0 : i32
    %c0_i32_0 = arith.constant 0 : i32
    %c0_i32_1 = arith.constant 0 : i32
    return %arg0, %c0_i32, %c0_i32_0 : i32, i32, i32
  }
  func.func @transform_1(%arg0: i32, %arg1: i32) -> (i32, i32) {
    %c0_i32 = arith.constant 0 : i32
    %c0_i32_0 = arith.constant 0 : i32
    %c0_i32_1 = arith.constant 0 : i32
    return %c0_i32, %c0_i32_0 : i32, i32
  }
  func.func @transform_2(%arg0: i32, %arg1: i32) -> (i32, i32, i32) {
    %c0_i32 = arith.constant 0 : i32
    %c0_i32_0 = arith.constant 0 : i32
    %c0_i32_1 = arith.constant 0 : i32
    return %arg1, %c0_i32, %c0_i32_0 : i32, i32, i32
  }
  func.func @transform_3(%arg0: i32, %arg1: i32) -> (i32, i32, i32) {
    %c0_i32 = arith.constant 0 : i32
    %c0_i32_0 = arith.constant 0 : i32
    %c0_i32_1 = arith.constant 0 : i32
    return %arg1, %c0_i32, %c0_i32_0 : i32, i32, i32
  }
  func.func @transform_4(%arg0: i32, %arg1: i32) -> (i32, i32, i32) {
    %c0_i32 = arith.constant 0 : i32
    %c0_i32_0 = arith.constant 0 : i32
    %c0_i32_1 = arith.constant 0 : i32
    return %arg1, %c0_i32, %c0_i32_0 : i32, i32, i32
  }
  func.func @transform_5(%arg0: i32, %arg1: i32) -> (i32, i32, i32) {
    %c0_i32 = arith.constant 0 : i32
    %c0_i32_0 = arith.constant 0 : i32
    %c0_i32_1 = arith.constant 0 : i32
    return %arg1, %c0_i32, %c0_i32_0 : i32, i32, i32
  }
  func.func @transform_6(%arg0: i32, %arg1: i32) -> (i32, i32, i32) {
    %c0_i32 = arith.constant 0 : i32
    %c0_i32_0 = arith.constant 0 : i32
    %c0_i32_1 = arith.constant 0 : i32
    return %arg1, %c0_i32, %c0_i32_0 : i32, i32, i32
  }
  func.func @transform_7(%arg0: i32, %arg1: i32) -> (i32, i32, i32) {
    %c0_i32 = arith.constant 0 : i32
    %c0_i32_0 = arith.constant 0 : i32
    %c0_i32_1 = arith.constant 0 : i32
    return %arg1, %c0_i32, %c0_i32_0 : i32, i32, i32
  }
  func.func @transform_8(%arg0: i32, %arg1: i32) -> (i32, i32, i32) {
    %c0_i32 = arith.constant 0 : i32
    %c0_i32_0 = arith.constant 0 : i32
    %c0_i32_1 = arith.constant 0 : i32
    return %arg1, %c0_i32, %c0_i32_0 : i32, i32, i32
  }
  func.func @transform_9(%arg0: i32, %arg1: i32) -> (i32, i32, i32) {
    %c0_i32 = arith.constant 0 : i32
    %c0_i32_0 = arith.constant 0 : i32
    %c0_i32_1 = arith.constant 0 : i32
    return %arg1, %c0_i32, %c0_i32_0 : i32, i32, i32
  }
  func.func @transform_10(%arg0: i32, %arg1: i32) -> (i32, i32, i32) {
    %c0_i32 = arith.constant 0 : i32
    %c0_i32_0 = arith.constant 0 : i32
    %c0_i32_1 = arith.constant 0 : i32
    return %arg1, %c0_i32, %c0_i32_0 : i32, i32, i32
  }
  func.func @transform_11(%arg0: i32, %arg1: i32) -> (i32, i32, i32) {
    %c0_i32 = arith.constant 0 : i32
    %c0_i32_0 = arith.constant 0 : i32
    %c0_i32_1 = arith.constant 0 : i32
    return %arg1, %c0_i32, %c0_i32_0 : i32, i32, i32
  }
  func.func @transform_12(%arg0: i32, %arg1: i32) -> (i32, i32, i32) {
    %c0_i32 = arith.constant 0 : i32
    %c0_i32_0 = arith.constant 0 : i32
    %c0_i32_1 = arith.constant 0 : i32
    return %arg1, %c0_i32, %c0_i32_0 : i32, i32, i32
  }
  func.func @transform_13(%arg0: i32, %arg1: i32) -> (i32, i32, i32) {
    %c0_i32 = arith.constant 0 : i32
    %c0_i32_0 = arith.constant 0 : i32
    %c0_i32_1 = arith.constant 0 : i32
    return %arg1, %c0_i32, %c0_i32_0 : i32, i32, i32
  }
  func.func @transform_14(%arg0: i32, %arg1: i32) -> (i32, i32) {
    %c0_i32 = arith.constant 0 : i32
    %c0_i32_0 = arith.constant 0 : i32
    %c0_i32_1 = arith.constant 0 : i32
    return %c0_i32, %c0_i32_0 : i32, i32
  }
  func.func @transform_15(%arg0: i32, %arg1: i32) -> (i32, i32) {
    %c0_i32 = arith.constant 0 : i32
    %c0_i32_0 = arith.constant 0 : i32
    %c0_i32_1 = arith.constant 0 : i32
    return %c0_i32, %c0_i32_0 : i32, i32
  }
  func.func @transform_16(%arg0: i32, %arg1: i32) -> (i32, i32, i32) {
    %c0_i32 = arith.constant 0 : i32
    %c0_i32_0 = arith.constant 0 : i32
    %c0_i32_1 = arith.constant 0 : i32
    return %arg0, %c0_i32, %c0_i32_0 : i32, i32, i32
  }
}

</mosaic_0001>

<bundles_post_ra>
// kernel: tpu_custom_call.1
= control target key start
LH: loop header
LB: loop body
LE: loop exit
PB: predicated region body
PF: predicated region fallthrough
CT: control target
= control target key end

     0   :  { %s4172_s0 = inlined_call_operand.hbm [shape: f32[2,8,32], index: 0, kind: input, shape index: {}]   ;;  %s4173_s1 = inlined_call_operand.hbm [shape: f32[8,32], index: 1, kind: input, shape index: {}]   ;;  %s4174_s2 = inlined_call_operand.vmem [shape: bf16[2,32,96], index: 2, kind: input, shape index: {}]   ;;  %s4175_s3 = inlined_call_operand.hbm [shape: f32[2,1,96], index: 3, kind: input, shape index: {}]   ;;  %s4176_s4 = inlined_call_operand.vmem [shape: bf16[2,32,32], index: 4, kind: input, shape index: {}]   ;;  %s4177_s5 = inlined_call_operand.hbm [shape: f32[2,1,32], index: 5, kind: input, shape index: {}]   ;;  %s4178_s6 = inlined_call_operand.hbm [shape: f32[2,1,32], index: 6, kind: input, shape index: {}]   ;;  %s4179_s7 = inlined_call_operand.hbm [shape: f32[2,1,32], index: 7, kind: input, shape index: {}]   ;;  %s4180_s8 = inlined_call_operand.vmem [shape: bf16[2,32,64], index: 8, kind: input, shape index: {}]   ;;  %s4181_s9 = inlined_call_operand.hbm [shape: f32[2,1,64], index: 9, kind: input, shape index: {}]   ;;  %s4182_s10 = inlined_call_operand.vmem [shape: bf16[2,64,32], index: 10, kind: input, shape index: {}]   ;;  %s4183_s11 = inlined_call_operand.hbm [shape: f32[2,1,32], index: 11, kind: input, shape index: {}]   ;;  %s4184_s12 = inlined_call_operand.hbm [shape: f32[2,1,32], index: 12, kind: input, shape index: {}]   ;;  %s4185_s13 = inlined_call_operand.hbm [shape: f32[2,1,32], index: 13, kind: input, shape index: {}]   ;;  %s4186_s14 = inlined_call_operand.vmem [shape: bf16[32,128], index: 14, kind: input, shape index: {}]   ;;  %s4187_s15 = inlined_call_operand.vmem [shape: f32[1,128], index: 15, kind: input, shape index: {}]   ;;  %s4188_s16 = inlined_call_operand.hbm [shape: f32[2,8,128], index: 16, kind: output, shape index: {}]  }
   0x1   :  { %4211 = sst [smem:[#allocation28_spill]] %s4172_s0 }
   0x2   :  { %4212 = sst [smem:[#allocation29_spill]] %s4173_s1 }
   0x3   :  { %4213 = sst [smem:[#allocation30_spill]] %s4174_s2 }
   0x4   :  { %4214 = sst [smem:[#allocation31_spill]] %s4175_s3 }
   0x5   :  { %4215 = sst [smem:[#allocation32_spill]] %s4176_s4 }
   0x6   :  { %4216 = sst [smem:[#allocation33_spill]] %s4177_s5 }
   0x7   :  { %4217 = sst [smem:[#allocation34_spill]] %s4178_s6 }
   0x8   :  { %4218 = sst [smem:[#allocation35_spill]] %s4180_s8 }
   0x9   :  { %4219 = sst [smem:[#allocation36_spill]] %s4182_s10 }
   0xa   :  { %4220 = sst [smem:[#allocation37_spill]] %s4186_s14 }
   0xb   :  { %4221 = sst [smem:[#allocation38_spill]] %s4187_s15 }
   0xc   :  { %4222 = sst [smem:[#allocation39_spill]] %s4188_s16 }
   0xd   :  { %21 = vsyncpa [#allocation4], 0 }
   0xe   :  { %22 = vsyncpa [#allocation7], 0 }
   0xf   :  { %23 = vsyncpa [#allocation5], 0  ;;  %s3492_s21 = smov 0   ;;  %s3494_s22 = smov 0  }
  0x10   :  { %s3496_s23 = smov 0   ;;  %s3498_s24 = smov 0  }
  0x11   :  { %s3500_s25 = smov 0   ;;  %s3502_s26 = smov 0  }
  0x12 LB: > { %4223 = sst [smem:[#allocation21_spill]] %s3361_s23  ;;  %s3521_s27 = sadd.s32 4294967295, %s3373_s26   ;;  %s3373_s26 = sphi %s3502_s26, %s29_s26   ;;  %s3369_s25 = sphi %s3500_s25, %s4277_s25   ;;  %s3365_s24 = sphi %s3498_s24, %s4276_s24   ;;  %s3361_s23 = sphi %s3496_s23, %s4275_s23   ;;  %s3357_s22 = sphi %s3494_s22, %s4279_s22   ;;  %s3353_s21 = sphi %s3492_s21, %s4278_s21  }
  0x13   : > { %4224 = sst [smem:[#allocation22_spill]] %s3365_s24  ;;  %s38_s28 = sadd.s32 1, %s3369_s25 }
  0x14   : > { %4225 = sst [smem:[#allocation23_spill]] %s3369_s25  ;;  %p39_p0 = scmp.ge.s32.totalorder %s38_s28, 2 }
  0x15   : > { %4226 = sst [smem:[#allocation24_spill]] %s3373_s26  ;;  %s121_s29 = sadd.s32 1, %s3361_s23 }
  0x16   : > { %p128_p1 = scmp.ne.s32.totalorder %s3361_s23, %s3357_s22  ;;  %p129_p2 = scmp.eq.s32.totalorder %s3373_s26, 0 }
  0x17   : > { %s4281_s28 = smov (%p39_p0, %s38_s28), 0  ;;  %p134_p4 = scmp.ne.s32.totalorder %s3357_s22, %s3353_s21 }
  0x18   : > { %4227 = sst [smem:[#allocation25_spill]] %s4281_s28  ;;  %p3530_p3 = por %p129_p2, %p128_p1 }
  0x19   : > { %s118_s0 = ssub.s32 %s3369_s25, %s4281_s28  ;;  %p4193_p5 = scmp.eq.s32.totalorder %s3521_s27, 0 }
  0x1a   : > { %s4228_s30 = scalar_select %p3530_p3, 1, 0 }
  0x1b   : > { %p119_p6 = scmp.eq.s32.totalorder %s118_s0, 0  ;;  %p2526_p7 = scmp.ge.s32.totalorder %s3373_s26, 1 }
  0x1c   : > { %p3541_p8 = por %p4193_p5, %p134_p4  ;;  %p473_p9 = scmp.lt.s32.totalorder %s3373_s26, 3 }
  0x1d   : > { %s3547_s18 = scalar_select %p119_p6, %s3361_s23, %s121_s29  }
  0x1e   : > { %s4229_s17 = scalar_select %p3541_p8, 1, 0 }
  0x1f   : > { %4231 = sst [smem:[#allocation27_spill]] %s3547_s18  ;;  %p3549_p10 = pnand %p2526_p7, %p473_p9 }
  0x20   : > { %4230 = sst [smem:[#allocation26_spill]] %s4229_s17  ;;  %s3375_s20 = smov [#allocation3]  }
  0x21   : > { %s4232_s19 = scalar_select %p3549_p10, 1, 0 }
  0x22   : > { %p2818_p11 = pneg %p3549_p10  ;;  %s488_s21 = sshll.u32 %s3375_s20, 4  ;;  %s489_s21 = int_to_ptr.vmem [resolvable:$true] %s488_s21 }
  0x23   : > { %s4234_s16 = sld [smem:[#allocation28_spill]] }
  0x24   : > { %p3557_p12 = pnand %p2818_p11, %p4193_p5 }
  0x26   : > { %s4233_s0 = scalar_select %p3557_p12, 1, 0 }
  0x27   : > { %p4199_p1 = pneg %p3557_p12 }
  0x29   : > { %s2989_s15 = scalar_lea.hbm %s4234_s16, 256 }
  0x2a   : > { %p2990_p0 = scmp.ne.s32.totalorder %s4234_s16, %s2989_s15  ;;  %p2996_p6 = scmp.lt.u32.totalorder %s2989_s15, %s4234_s16 }
  0x2c   : > { %p2992_p2 = pnand %p4199_p1, %p2990_p0 }
  0x2e   : > { %p2993_p4 = pneg %p2992_p2 }
  0x30   : > { %p2998_p7 = pnand %p2996_p6, %p2993_p4 }
  0x32   : > { %3001 = shalt.err (!%p2998_p7)
}
  0x33   : > { %s3002_s29 = scalar_lea.vmem %s489_s21, 256  ;;  %p3010_p13 = scmp.lt.s32.totalorder %s489_s21, %s489_s21 }
  0x34   : > { %p3003_p9 = scmp.ne.s32.totalorder %s489_s21, %s3002_s29  ;;  %p3011_p8 = scmp.lt.s32.totalorder %s3002_s29, %s3002_s29 }
  0x36   : > { %p3005_p11 = pnand %p3003_p9, %p4199_p1  ;;  %p3012_p10 = por %p3011_p8, %p3010_p13 }
  0x38   : > { %p3006_p5 = pneg %p3005_p11 }
  0x3a   : > { %p3013_p3 = pnand %p3012_p10, %p3006_p5 }
  0x3c   : > { %3016 = shalt.err (!%p3013_p3)
}
  0x3d   : > { %s3376_s10 = smov 128   ;;  %s3377_s8 = smov 8  }
  0x3e   : > { %2821 = dma.hbm_to_vmem [thread:$0]  (!%p3557_p12), %s4234_s16, 256, %s489_s21, [#allocation4], %s3376_s10, %s3376_s10, %s3377_s8  }
  0x3f   : > { %p4235_p0 = scmp.ne.s32.totalorder %s4228_s30, 0  ;;  %p4236_p2 = scmp.lt.s32.totalorder %s3373_s26, 2 }
  0x40   : > { %s3594_s18 = sand.u32 1, %s3361_s23   ;;  %s3597_s29 = sshll.u32 %s3369_s25, 4 }
  0x41   : > { %p3589_p4 = pnand %p4236_p2, %p4235_p0  ;;  %s4238_s3 = sld [smem:[#allocation31_spill]] }
  0x42   : > { %s530_s30 = scalar_lea.vmem [#allocation8], %s3594_s18  ;;  %s4239_s5 = sld [smem:[#allocation33_spill]] }
  0x43   : > { %s4237_s28 = scalar_select %p3589_p4, 1, 0 }
  0x44   : > { %s537_s21 = sshll.u32 %s530_s30, 4  ;;  %s4240_s15 = sand.u32 1, %s3373_s26   ;;  %s3606_s21 = int_to_ptr.vmem [resolvable:$true] %s537_s21 }
  0x45   : > { %s3616_s16 = scalar_lea.sflag [#allocation4], %s4240_s15  ;;  %p3622_p5 = pneg %p3589_p4 }
  0x47   : > { %s3603_s2 = scalar_lea.hbm %s4238_s3, %s3597_s29  ;;  %s3022_s10 = scalar_lea.hbm %s4238_s3, 32 }
  0x48   : > { %s3612_s14 = scalar_lea.hbm %s4239_s5, %s3597_s29  ;;  %s3017_s4 = scalar_lea.hbm %s3603_s2, 16 }
  0x49   : > { %p3018_p3 = scmp.ne.s32.totalorder %s3603_s2, %s3017_s4  ;;  %p3023_p13 = scmp.lt.u32.totalorder %s3603_s2, %s4238_s3 }
  0x4a   : > { %s4241_s20 = scalar_select %p3622_p5, 1, 0 }
  0x4b   : > { %p3020_p8 = pnand %p3622_p5, %p3018_p3  ;;  %p3024_p6 = scmp.lt.u32.totalorder %s3022_s10, %s3017_s4 }
  0x4c   : > { %p3026_p9 = scmp.lt.u32.totalorder %s3017_s4, %s3603_s2 }
  0x4d   : > { %p3021_p10 = pneg %p3020_p8  ;;  %p3025_p7 = por %p3024_p6, %p3023_p13 }
  0x4f   : > { %p3027_p11 = por %p3026_p9, %p3025_p7 }
  0x51   : > { %p3028_p0 = pnand %p3027_p11, %p3021_p10 }
  0x53   : > { %3031 = shalt.err (!%p3028_p0)
}
  0x54   : > { %s3032_s15 = scalar_lea.vmem %s3606_s21, 16  ;;  %s3378_s25 = smov [#allocation8]  }
  0x55   : > { %p3033_p2 = scmp.ne.s32.totalorder %s3606_s21, %s3032_s15  ;;  %s3037_s30 = sshll.u32 %s3378_s25, 4  ;;  %s3038_s30 = int_to_ptr.vmem [resolvable:$false] %s3037_s30 }
  0x56   : > { %s3039_s23 = scalar_lea.vmem %s3038_s30, 32  ;;  %p3040_p1 = scmp.lt.s32.totalorder %s3606_s21, %s3038_s30 }
  0x57   : > { %p3035_p3 = pnand %p3033_p2, %p3622_p5  ;;  %p3041_p12 = scmp.lt.s32.totalorder %s3039_s23, %s3032_s15 }
  0x59   : > { %p3036_p8 = pneg %p3035_p3  ;;  %p3042_p13 = por %p3041_p12, %p3040_p1 }
  0x5b   : > { %p3043_p6 = pnand %p3042_p13, %p3036_p8 }
  0x5d   : > { %3046 = shalt.err (!%p3043_p6)
}
  0x5e   : > { %2828 = dma.hbm_to_vmem [thread:$0]  (!%p3589_p4), %s3603_s2, 16, %s3606_s21, %s3616_s16  }
  0x5f   : > { %s555_s4 = scalar_lea.vmem [#allocation9], %s3594_s18  ;;  %s4242_s6 = sld [smem:[#allocation34_spill]] }
  0x60   : > { %s562_s10 = sshll.u32 %s555_s4, 4  ;;  %s3047_s30 = scalar_lea.hbm %s3612_s14, 16  ;;  %s563_s10 = int_to_ptr.vmem [resolvable:$true] %s562_s10 }
  0x61   : > { %p3048_p12 = scmp.ne.s32.totalorder %s3612_s14, %s3047_s30  ;;  %s3052_s26 = scalar_lea.hbm %s4239_s5, 32 }
  0x62   : > { %p3053_p7 = scmp.lt.u32.totalorder %s3612_s14, %s4239_s5  ;;  %p3054_p9 = scmp.lt.u32.totalorder %s3052_s26, %s3047_s30 }
  0x63   : > { %p3050_p1 = pnand %p3048_p12, %p3622_p5  ;;  %p3056_p0 = scmp.lt.u32.totalorder %s3047_s30, %s3612_s14 }
  0x64   : > { %p3055_p11 = por %p3054_p9, %p3053_p7 }
  0x65   : > { %s3651_s25 = scalar_lea.hbm %s4242_s6, %s3597_s29  ;;  %p3051_p10 = pneg %p3050_p1 }
  0x66   : > { %p3057_p2 = por %p3056_p0, %p3055_p11 }
  0x68   : > { %p3058_p3 = pnand %p3057_p2, %p3051_p10 }
  0x6a   : > { %3061 = shalt.err (!%p3058_p3)
}
  0x6b   : > { %s3062_s2 = scalar_lea.vmem %s563_s10, 16  ;;  %s3379_s21 = smov [#allocation9]  }
  0x6c   : > { %p3063_p8 = scmp.ne.s32.totalorder %s563_s10, %s3062_s2  ;;  %s3067_s4 = sshll.u32 %s3379_s21, 4  ;;  %s3068_s4 = int_to_ptr.vmem [resolvable:$false] %s3067_s4 }
  0x6d   : > { %s3069_s3 = scalar_lea.vmem %s3068_s4, 32  ;;  %p3070_p12 = scmp.lt.s32.totalorder %s563_s10, %s3068_s4 }
  0x6e   : > { %p3065_p13 = pnand %p3063_p8, %p3622_p5  ;;  %p3071_p1 = scmp.lt.s32.totalorder %s3069_s3, %s3062_s2 }
  0x70   : > { %p3066_p6 = pneg %p3065_p13  ;;  %p3072_p4 = por %p3071_p1, %p3070_p12 }
  0x72   : > { %p3073_p7 = pnand %p3072_p4, %p3066_p6 }
  0x74   : > { %3076 = shalt.err (!%p3073_p7)
}
  0x75   : > { %p4243_p9 = scmp.ne.s32.totalorder %s4237_s28, 0  ;;  %s572_s24 = scalar_lea.vmem [#allocation10], %s3594_s18 }
  0x76   : > { %s579_s26 = sshll.u32 %s572_s24, 4  ;;  %s3676_s15 = scalar_lea.hbm %s4179_s7, %s3597_s29  ;;  %s580_s26 = int_to_ptr.vmem [resolvable:$true] %s579_s26 }
  0x77   : > { %2831 = dma.hbm_to_vmem [thread:$0]  (!%p4243_p9), %s3612_s14, 16, %s563_s10, %s3616_s16  }
  0x78   : > { %s3077_s30 = scalar_lea.hbm %s3651_s25, 16  ;;  %s3082_s21 = scalar_lea.hbm %s4242_s6, 32 }
  0x79   : > { %p3078_p4 = scmp.ne.s32.totalorder %s3651_s25, %s3077_s30  ;;  %p3083_p0 = scmp.lt.u32.totalorder %s3651_s25, %s4242_s6 }
  0x7a   : > { %p3084_p2 = scmp.lt.u32.totalorder %s3082_s21, %s3077_s30  ;;  %p3086_p8 = scmp.lt.u32.totalorder %s3077_s30, %s3651_s25 }
  0x7b   : > { %p3080_p10 = pnand %p3078_p4, %p3622_p5 }
  0x7c   : > { %p3085_p3 = por %p3084_p2, %p3083_p0 }
  0x7d   : > { %p3081_p11 = pneg %p3080_p10 }
  0x7e   : > { %p3087_p13 = por %p3086_p8, %p3085_p3 }
  0x80   : > { %p3088_p6 = pnand %p3087_p13, %p3081_p11 }
  0x82   : > { %3091 = shalt.err (!%p3088_p6)
}
  0x83   : > { %s3092_s14 = scalar_lea.vmem %s580_s26, 16  ;;  %s3380_s10 = smov [#allocation10]  }
  0x84   : > { %p3093_p12 = scmp.ne.s32.totalorder %s580_s26, %s3092_s14  ;;  %s3097_s24 = sshll.u32 %s3380_s10, 4  ;;  %s3098_s24 = int_to_ptr.vmem [resolvable:$false] %s3097_s24 }
  0x85   : > { %s3099_s17 = scalar_lea.vmem %s3098_s24, 32  ;;  %p3100_p4 = scmp.lt.s32.totalorder %s580_s26, %s3098_s24 }
  0x86   : > { %p3095_p1 = pnand %p3093_p12, %p3622_p5  ;;  %p3101_p10 = scmp.lt.s32.totalorder %s3099_s17, %s3092_s14 }
  0x88   : > { %p3096_p7 = pneg %p3095_p1  ;;  %p3102_p9 = por %p3101_p10, %p3100_p4 }
  0x8a   : > { %p3103_p0 = pnand %p3102_p9, %p3096_p7 }
  0x8c   : > { %3106 = shalt.err (!%p3103_p0)
}
  0x8d   : > { %p4244_p2 = scmp.ne.s32.totalorder %s4237_s28, 0  ;;  %s589_s8 = scalar_lea.vmem [#allocation11], %s3594_s18 }
  0x8e   : > { %s596_s30 = sshll.u32 %s589_s8, 4  ;;  %s3701_s21 = scalar_lea.hbm %s4181_s9, %s3597_s29  ;;  %s597_s30 = int_to_ptr.vmem [resolvable:$true] %s596_s30 }
  0x8f   : > { %2834 = dma.hbm_to_vmem [thread:$0]  (!%p4244_p2), %s3651_s25, 16, %s580_s26, %s3616_s16  }
  0x90   : > { %s3107_s4 = scalar_lea.hbm %s3676_s15, 16  ;;  %s3112_s10 = scalar_lea.hbm %s4179_s7, 32 }
  0x91   : > { %p3108_p9 = scmp.ne.s32.totalorder %s3676_s15, %s3107_s4  ;;  %p3113_p8 = scmp.lt.u32.totalorder %s3676_s15, %s4179_s7 }
  0x92   : > { %p3114_p13 = scmp.lt.u32.totalorder %s3112_s10, %s3107_s4  ;;  %p3116_p12 = scmp.lt.u32.totalorder %s3107_s4, %s3676_s15 }
  0x93   : > { %p3110_p11 = pnand %p3108_p9, %p3622_p5 }
  0x94   : > { %p3115_p6 = por %p3114_p13, %p3113_p8 }
  0x95   : > { %p3111_p3 = pneg %p3110_p11 }
  0x96   : > { %p3117_p1 = por %p3116_p12, %p3115_p6 }
  0x98   : > { %p3118_p7 = pnand %p3117_p1, %p3111_p3 }
  0x9a   : > { %3121 = shalt.err (!%p3118_p7)
}
  0x9b   : > { %s3122_s25 = scalar_lea.vmem %s597_s30, 16  ;;  %s3381_s26 = smov [#allocation11]  }
  0x9c   : > { %p3123_p4 = scmp.ne.s32.totalorder %s597_s30, %s3122_s25  ;;  %s3127_s8 = sshll.u32 %s3381_s26, 4  ;;  %s3128_s8 = int_to_ptr.vmem [resolvable:$false] %s3127_s8 }
  0x9d   : > { %s3129_s23 = scalar_lea.vmem %s3128_s8, 32  ;;  %p3130_p9 = scmp.lt.s32.totalorder %s597_s30, %s3128_s8 }
  0x9e   : > { %p3125_p10 = pnand %p3123_p4, %p3622_p5  ;;  %p3131_p11 = scmp.lt.s32.totalorder %s3129_s23, %s3122_s25 }
  0xa0   : > { %p3126_p0 = pneg %p3125_p10  ;;  %p3132_p2 = por %p3131_p11, %p3130_p9 }
  0xa2   : > { %p3133_p8 = pnand %p3132_p2, %p3126_p0 }
  0xa4   : > { %3136 = shalt.err (!%p3133_p8)
}
  0xa5   : > { %p4245_p13 = scmp.ne.s32.totalorder %s4237_s28, 0  ;;  %s614_s2 = scalar_lea.vmem [#allocation12], %s3594_s18 }
  0xa6   : > { %s621_s4 = sshll.u32 %s614_s2, 4  ;;  %s3726_s10 = scalar_lea.hbm %s4183_s11, %s3597_s29  ;;  %s622_s4 = int_to_ptr.vmem [resolvable:$true] %s621_s4 }
  0xa7   : > { %2837 = dma.hbm_to_vmem [thread:$0]  (!%p4245_p13), %s3676_s15, 16, %s597_s30, %s3616_s16  }
  0xa8   : > { %s3137_s24 = scalar_lea.hbm %s3701_s21, 16  ;;  %s3142_s26 = scalar_lea.hbm %s4181_s9, 32 }
  0xa9   : > { %p3138_p2 = scmp.ne.s32.totalorder %s3701_s21, %s3137_s24  ;;  %p3143_p12 = scmp.lt.u32.totalorder %s3701_s21, %s4181_s9 }
  0xaa   : > { %p3144_p1 = scmp.lt.u32.totalorder %s3142_s26, %s3137_s24  ;;  %p3146_p4 = scmp.lt.u32.totalorder %s3137_s24, %s3701_s21 }
  0xab   : > { %p3140_p3 = pnand %p3138_p2, %p3622_p5 }
  0xac   : > { %p3145_p7 = por %p3144_p1, %p3143_p12 }
  0xad   : > { %p3141_p6 = pneg %p3140_p3 }
  0xae   : > { %p3147_p10 = por %p3146_p4, %p3145_p7 }
  0xb0   : > { %p3148_p0 = pnand %p3147_p10, %p3141_p6 }
  0xb2   : > { %3151 = shalt.err (!%p3148_p0)
}
  0xb3   : > { %s3152_s15 = scalar_lea.vmem %s622_s4, 16  ;;  %s3382_s30 = smov [#allocation12]  }
  0xb4   : > { %p3153_p9 = scmp.ne.s32.totalorder %s622_s4, %s3152_s15  ;;  %s3157_s2 = sshll.u32 %s3382_s30, 4  ;;  %s3158_s2 = int_to_ptr.vmem [resolvable:$false] %s3157_s2 }
  0xb5   : > { %s3159_s3 = scalar_lea.vmem %s3158_s2, 32  ;;  %p3160_p2 = scmp.lt.s32.totalorder %s622_s4, %s3158_s2 }
  0xb6   : > { %p3155_p11 = pnand %p3153_p9, %p3622_p5  ;;  %p3161_p3 = scmp.lt.s32.totalorder %s3159_s3, %s3152_s15 }
  0xb8   : > { %p3156_p8 = pneg %p3155_p11  ;;  %p3162_p13 = por %p3161_p3, %p3160_p2 }
  0xba   : > { %p3163_p1 = pnand %p3162_p13, %p3156_p8 }
  0xbc   : > { %3166 = shalt.err (!%p3163_p1)
}
  0xbd   : > { %p4246_p12 = scmp.ne.s32.totalorder %s4237_s28, 0  ;;  %s639_s14 = scalar_lea.vmem [#allocation13], %s3594_s18 }
  0xbe   : > { %s646_s24 = sshll.u32 %s639_s14, 4  ;;  %s3751_s26 = scalar_lea.hbm %s4184_s12, %s3597_s29  ;;  %s647_s24 = int_to_ptr.vmem [resolvable:$true] %s646_s24 }
  0xbf   : > { %2840 = dma.hbm_to_vmem [thread:$0]  (!%p4246_p12), %s3701_s21, 16, %s622_s4, %s3616_s16  }
  0xc0   : > { %s3167_s8 = scalar_lea.hbm %s3726_s10, 16  ;;  %s3172_s30 = scalar_lea.hbm %s4183_s11, 32 }
  0xc1   : > { %p3168_p13 = scmp.ne.s32.totalorder %s3726_s10, %s3167_s8  ;;  %p3173_p4 = scmp.lt.u32.totalorder %s3726_s10, %s4183_s11 }
  0xc2   : > { %p3174_p10 = scmp.lt.u32.totalorder %s3172_s30, %s3167_s8  ;;  %p3176_p9 = scmp.lt.u32.totalorder %s3167_s8, %s3726_s10 }
  0xc3   : > { %p3170_p6 = pnand %p3168_p13, %p3622_p5 }
  0xc4   : > { %p3175_p0 = por %p3174_p10, %p3173_p4 }
  0xc5   : > { %p3171_p7 = pneg %p3170_p6 }
  0xc6   : > { %p3177_p11 = por %p3176_p9, %p3175_p0 }
  0xc8   : > { %p3178_p8 = pnand %p3177_p11, %p3171_p7 }
  0xca   : > { %3181 = shalt.err (!%p3178_p8)
}
  0xcb   : > { %s3182_s21 = scalar_lea.vmem %s647_s24, 16  ;;  %s3383_s4 = smov [#allocation13]  }
  0xcc   : > { %p3183_p2 = scmp.ne.s32.totalorder %s647_s24, %s3182_s21  ;;  %s3187_s14 = sshll.u32 %s3383_s4, 4  ;;  %s3188_s14 = int_to_ptr.vmem [resolvable:$false] %s3187_s14 }
  0xcd   : > { %s3189_s17 = scalar_lea.vmem %s3188_s14, 32  ;;  %p3190_p13 = scmp.lt.s32.totalorder %s647_s24, %s3188_s14 }
  0xce   : > { %p3185_p3 = pnand %p3183_p2, %p3622_p5  ;;  %p3191_p6 = scmp.lt.s32.totalorder %s3189_s17, %s3182_s21 }
  0xd0   : > { %p3186_p1 = pneg %p3185_p3  ;;  %p3192_p12 = por %p3191_p6, %p3190_p13 }
  0xd2   : > { %p3193_p4 = pnand %p3192_p12, %p3186_p1 }
  0xd4   : > { %3196 = shalt.err (!%p3193_p4)
}
  0xd5   : > { %p4247_p10 = scmp.ne.s32.totalorder %s4237_s28, 0  ;;  %s656_s25 = scalar_lea.vmem [#allocation14], %s3594_s18 }
  0xd6   : > { %s663_s8 = sshll.u32 %s656_s25, 4  ;;  %s3384_s23 = smov [#allocation6]   ;;  %s3772_s8 = int_to_ptr.vmem [resolvable:$true] %s663_s8 }
  0xd7   : > { %2843 = dma.hbm_to_vmem [thread:$0]  (!%p4247_p10), %s3726_s10, 16, %s647_s24, %s3616_s16  }
  0xd8   : > { %s502_s15 = sshll.u32 %s3384_s23, 4  ;;  %s3197_s30 = scalar_lea.hbm %s3751_s26, 16  ;;  %s503_s15 = int_to_ptr.vmem [resolvable:$true] %s502_s15 }
  0xd9   : > { %p3198_p12 = scmp.ne.s32.totalorder %s3751_s26, %s3197_s30  ;;  %s3202_s21 = scalar_lea.hbm %s4184_s12, 32 }
  0xda   : > { %p3203_p9 = scmp.lt.u32.totalorder %s3751_s26, %s4184_s12  ;;  %p3204_p11 = scmp.lt.u32.totalorder %s3202_s21, %s3197_s30 }
  0xdb   : > { %p3200_p7 = pnand %p3198_p12, %p3622_p5  ;;  %p3206_p2 = scmp.lt.u32.totalorder %s3197_s30, %s3751_s26 }
  0xdc   : > { %p3205_p8 = por %p3204_p11, %p3203_p9 }
  0xdd   : > { %p3201_p0 = pneg %p3200_p7 }
  0xde   : > { %p3207_p3 = por %p3206_p2, %p3205_p8 }
  0xe0   : > { %p3208_p1 = pnand %p3207_p3, %p3201_p0 }
  0xe2   : > { %3211 = shalt.err (!%p3208_p1)
}
  0xe3   : > { %s3212_s10 = scalar_lea.vmem %s3772_s8, 16  ;;  %s3385_s24 = smov [#allocation14]  }
  0xe4   : > { %p3213_p13 = scmp.ne.s32.totalorder %s3772_s8, %s3212_s10  ;;  %s3217_s17 = sshll.u32 %s3385_s24, 4  ;;  %s3218_s17 = int_to_ptr.vmem [resolvable:$false] %s3217_s17 }
  0xe5   : > { %s3219_s25 = scalar_lea.vmem %s3218_s17, 32  ;;  %p3220_p12 = scmp.lt.s32.totalorder %s3772_s8, %s3218_s17 }
  0xe6   : > { %p3215_p6 = pnand %p3213_p13, %p3622_p5  ;;  %p3221_p7 = scmp.lt.s32.totalorder %s3219_s25, %s3212_s10 }
  0xe8   : > { %p3216_p4 = pneg %p3215_p6  ;;  %p3222_p9 = por %p3221_p7, %p3220_p12 }
  0xea   : > { %p3223_p11 = pnand %p3222_p9, %p3216_p4 }
  0xec   : > { %3226 = shalt.err (!%p3223_p11)
}
  0xed   : > { %2846 = dma.hbm_to_vmem [thread:$0]  (!%p4247_p10), %s3751_s26, 16, %s3772_s8, %s3616_s16  }
  0xee   : > { %s4248_s1 = sld [smem:[#allocation29_spill]]  ;;  %p4249_p8 = scmp.ne.s32.totalorder %s4233_s0, 0 }
  0xf0   : > { %p4250_p2 = pneg %p4249_p8 }
  0xf4   : > { %s3227_s2 = scalar_lea.hbm %s4248_s1, 128 }
  0xf5   : > { %p3228_p0 = scmp.ne.s32.totalorder %s4248_s1, %s3227_s2  ;;  %p3234_p13 = scmp.lt.u32.totalorder %s3227_s2, %s4248_s1 }
  0xf7   : > { %p3230_p3 = pnand %p3228_p0, %p4250_p2 }
  0xf9   : > { %p3231_p1 = pneg %p3230_p3 }
  0xfb   : > { %p3236_p6 = pnand %p3234_p13, %p3231_p1 }
  0xfd   : > { %3239 = shalt.err (!%p3236_p6)
}
  0xfe   : > { %s3240_s26 = scalar_lea.vmem %s503_s15, 128  ;;  %p4251_p12 = pmov %p4250_p2 }
  0xff   : > { %p3241_p4 = scmp.ne.s32.totalorder %s503_s15, %s3240_s26  ;;  %p3248_p11 = scmp.lt.s32.totalorder %s503_s15, %s503_s15 }
 0x100   : > { %p3249_p10 = scmp.lt.s32.totalorder %s3240_s26, %s3240_s26 }
 0x101   : > { %p3243_p7 = pnand %p3241_p4, %p4251_p12 }
 0x102   : > { %p3250_p5 = por %p3249_p10, %p3248_p11 }
 0x103   : > { %p3244_p9 = pneg %p3243_p7 }
 0x105   : > { %p3251_p0 = pnand %p3250_p5, %p3244_p9 }
 0x107   : > { %3254 = shalt.err (!%p3251_p0)
}
 0x108   : > { %2824 = dma.hbm_to_vmem [thread:$0]  (!%p4249_p8), %s4248_s1, 128, %s503_s15, [#allocation7]  }
 0x109   : > { %s3820_s25 = scalar_lea.hbm %s4185_s13, %s3597_s29  ;;  %s673_s23 = scalar_lea.vmem [#allocation15], %s3594_s18 }
 0x10a   : > { %s680_s30 = sshll.u32 %s673_s23, 4  ;;  %s3255_s0 = scalar_lea.hbm %s3820_s25, 16  ;;  %s681_s30 = int_to_ptr.vmem [resolvable:$true] %s680_s30 }
 0x10b   : > { %p3256_p5 = scmp.ne.s32.totalorder %s3820_s25, %s3255_s0  ;;  %p4252_p10 = scmp.ne.s32.totalorder %s4241_s20, 0 }
 0x10c   : > { %s3260_s15 = scalar_lea.hbm %s4185_s13, 32  ;;  %p3261_p8 = scmp.lt.u32.totalorder %s3820_s25, %s4185_s13 }
 0x10d   : > { %p3258_p2 = pnand %p3256_p5, %p4252_p10  ;;  %p3262_p1 = scmp.lt.u32.totalorder %s3260_s15, %s3255_s0 }
 0x10e   : > { %p3264_p6 = scmp.lt.u32.totalorder %s3255_s0, %s3820_s25 }
 0x10f   : > { %p3259_p3 = pneg %p3258_p2  ;;  %p3263_p13 = por %p3262_p1, %p3261_p8 }
 0x111   : > { %p3265_p4 = por %p3264_p6, %p3263_p13 }
 0x113   : > { %p3266_p12 = pnand %p3265_p4, %p3259_p3 }
 0x115   : > { %3269 = shalt.err (!%p3266_p12)
}
 0x116   : > { %s3270_s18 = scalar_lea.vmem %s681_s30, 16  ;;  %s3386_s29 = smov [#allocation15]  }
 0x117   : > { %p3271_p7 = scmp.ne.s32.totalorder %s681_s30, %s3270_s18  ;;  %s3275_s14 = sshll.u32 %s3386_s29, 4  ;;  %s3276_s14 = int_to_ptr.vmem [resolvable:$false] %s3275_s14 }
 0x118   : > { %s3277_s26 = scalar_lea.vmem %s3276_s14, 32  ;;  %p3278_p0 = scmp.lt.s32.totalorder %s681_s30, %s3276_s14 }
 0x119   : > { %p3273_p9 = pnand %p3271_p7, %p4252_p10  ;;  %p3279_p5 = scmp.lt.s32.totalorder %s3277_s26, %s3270_s18 }
 0x11b   : > { %p3274_p11 = pneg %p3273_p9  ;;  %p3280_p2 = por %p3279_p5, %p3278_p0 }
 0x11d   : > { %p3281_p1 = pnand %p3280_p2, %p3274_p11 }
 0x11f   : > { %3284 = shalt.err (!%p3281_p1)
}
 0x120   : > { %p4253_p8 = scmp.ne.s32.totalorder %s4237_s28, 0  ;;  %p4254_p3 = scmp.ne.s32.totalorder %s4232_s19, 0 }
 0x121   : > { %p4255_p10 = scmp.eq.s32.totalorder (!%p4254_p3), %s3521_s27, 0 }
 0x122   : > { %2849 = dma.hbm_to_vmem [thread:$0]  (!%p4253_p8), %s3820_s25, 16, %s681_s30, %s3616_s16  }
 0x123   : > { %689 = sbr.rel (%p4254_p3) target bundleno = 4374 (0x1116), region = 84 }
 0x12a   : > { %3336 = dma.done.wait (%p4255_p10), [#allocation4], 256   ;;  %p4256_p13 = pmov %p4255_p10 }
 0x12b   : > { %p4257_p6 = pmov %p4255_p10 }
 0x12c   : > { %3338 = vsyncadd (%p4256_p13), [#allocation4], 4294967040 }
 0x12d   : > { %3340 = dma.done.wait (%p4257_p6), [#allocation7], 128   ;;  %p4258_p4 = pmov %p4257_p6 }
 0x12e   : > { %s4259_s28 = sld [smem:[#allocation26_spill]]  ;;  %s699_s20 = sand.u32 1, %s3521_s27  }
 0x12f   : > { %3342 = vsyncadd (%p4258_p4), [#allocation7], 4294967168  ;;  %s3853_s16 = sand.u32 1, %s3357_s22   ;;  %s700_s19 = scalar_lea.sflag [#allocation4], %s699_s20 }
 0x134   : > { %p4260_p12 = scmp.ne.s32.totalorder %s4259_s28, 0 }
 0x136   : > { %3344 = dma.done.wait (%p4260_p12), %s700_s19, 128  }
 0x137   : > { %3346 = vsyncadd (%p4260_p12), %s700_s19, 4294967168  ;;  %s4261_s10 = sld [smem:[#allocation22_spill]]  ;;  %s4262_s0 = sld [smem:[#allocation30_spill]] }
 0x138   : > { %s4263_s21 = sld [smem:[#allocation32_spill]]  ;;  %s4264_s14 = sld [smem:[#allocation35_spill]] }
 0x139   : > { %s4265_s19 = sld [smem:[#allocation36_spill]]  ;;  %s718_s1 = scalar_lea.vmem [#allocation10], %s3853_s16 }
 0x13a   : > { %s726_s5 = scalar_lea.vmem [#allocation11], %s3853_s16  ;;  %s734_s23 = scalar_lea.vmem [#allocation12], %s3853_s16 }
 0x13b   : > { %s742_s30 = scalar_lea.vmem [#allocation13], %s3853_s16  ;;  %s758_s6 = scalar_lea.vmem [#allocation15], %s3853_s16 }
 0x13d   : > { %p850_p7 = scmp.lt.s32.totalorder %s4261_s10, 1  ;;  %p2549_p9 = scmp.ne.s32.totalorder %s4261_s10, 0 }
 0x13e   : > { %v876_v0 = vld [vmem:[#allocation3] sm:$0xff] (!%p2549_p9)  ;;  %v878_v1 = vld [vmem:[#allocation6] sm:$0xff] (!%p2549_p9)  ;;  %vm881_vm0 = vcmask (!%p2549_p9), 261120   ;;  %v877_v2 = vld [vmem:[#allocation3 + $0x8] sm:$0xff] (!%p2549_p9) }
 0x13f   : > { %s851_s24 = scalar_select %p850_p7, %s4261_s10, 1 }
 0x140   : > { %875 = sbr.rel (%p2549_p9) target bundleno = 327 (0x147), region = 128  ;;  %v879_v3 = vadd.f32 (!%p2549_p9), %v878_v1, %v876_v0  ;;  %v880_v4 = vadd.f32 (!%p2549_p9), %v878_v1, %v877_v2 }
 0x141   : > { %s2597_s17 = sshll.u32 %s851_s24, 4  ;;  %s2600_s25 = sshll.u32 %s851_s24, 5 }
 0x142   : > { %s854_s2 = scalar_lea.vmem %s4262_s0, %s2597_s17  ;;  %s3868_s4 = scalar_lea.vmem %s4263_s21, %s2597_s17  ;;  %882 = vst.msk [vmem:[#allocation2] sm:$0xff] (!%p2549_p9), %vm881_vm0, %v879_v3  ;;  %883 = vst.msk [vmem:[#allocation2 + $0x8] sm:$0xff] (!%p2549_p9), %vm881_vm0, %v880_v4 }
 0x143   : > { %s3873_s26 = scalar_lea.vmem %s4264_s14, %s2597_s17  ;;  %s3878_s8 = scalar_lea.vmem %s4265_s19, %s2600_s25 }
 0x144   : > { %s710_s24 = scalar_lea.vmem [#allocation9], %s3853_s16  ;;  %s750_s0 = scalar_lea.vmem [#allocation14], %s3853_s16 }
 0x147 PF: > { %v2929_v5 = vld [vmem:[%s854_s2] sm:$0xff]   ;;  %v3387_v6 = vmov 0.0   ;;  %v2930_v7 = vld [vmem:[%s854_s2 + $0x8] sm:$0xff]   ;;  %vm3388_vm1 = vmmov 0   ;;  %vm910_vm2 = vcmask 261120   ;;  %s4266_s10 = scalar_lea.vmem [#allocation8], %s3853_s16 }
 0x148   : > { %2650 = vmatprep.subr.bf16.mxu0 %v3387_v6  ;;  %2658 = vmatprep.subr.bf16.mxu1 %v3387_v6  ;;  %v2550_v11 = vld [vmem:[%s4266_s10] ss:$0 sm:$0xff]  ;;  %s3389_s17 = smov 96   ;;  %s3390_s25 = smov 64   ;;  %vm960_vm3 = vcmask 64512   ;;  %vm1081_vm4 = vcmask 1043456  }
 0x149   : > { %2651 = vmatpush3.bf16.msra.mxu0 %v2929_v5  ;;  %2654 = vmatprep.mubr.msk.bf16.mxu0 %vm3388_vm1, %v3387_v6  ;;  %v3892_v8 = vld [vmem:[#allocation2] sm:$0xff]  ;;  %v3894_v9 = vld [vmem:[#allocation2 + $0x8] sm:$0xff]  ;;  %s3391_s2 = smov 88   ;;  %s3392_s3 = smov 120   ;;  %vm1853_vm5 = vcmask 130048   ;;  %vm1856_vm6 = vcmask 195584  }
 0x14a   : > { %2652 = vmatprep.subr.bf16.mxu0 %v3387_v6  ;;  %2660 = vmatprep.mubr.msk.bf16.mxu1 %vm3388_vm1, %v3387_v6  ;;  %v886_v10 = vpack.c.bf16 %v3894_v9, %v3892_v8  ;;  %s3393_s15 = smov 56   ;;  %s3394_s21 = smov 80   ;;  %vm2082_vm7 = vcmask 523264  }
 0x14b   : > { %s3395_s18 = smov 112   ;;  %s3396_s29 = smov 48  }
 0x14c   : > { %s3397_s14 = smov 72   ;;  %s3398_s28 = smov 104  }
 0x14d   : > { %2653 = vmatpush3.bf16.msra.mxu0 %v2930_v7  ;;  %s3399_s20 = smov 40   ;;  %s3400_s19 = smov 8  }
 0x14e   : > { %2664 = vmatprep.subr.bf16.mxu0 %v3387_v6  ;;  %s3401_s10 = smov 16  }
 0x150   : > { %2655 = vmatmul.mubr.msk.bf16.vlgmr.msra.gmra.mrb[0].mxu0 %vm910_vm2, %v886_v10 }
 0x151   : > { %2666 = vmatprep.mubr.msk.bf16.mxu0 %vm3388_vm1, %v3387_v6 }
 0x223   : > { %v948_v12 = vpop.f32.mrb[0].mxu0 }
 0x224   : > { %v949_v13 = vadd.f32 %v2550_v11, %v948_v12  ;;  %v2656_v14 = vpop.f32.mrb[1].mxu0 }
 0x225   : > { %v951_v15 = vpop.f32.mrb[2].mxu0 }
 0x226   : > { %v3907_v16 = vpack.c.bf16 %v949_v13, %v949_v13  ;;  %v952_v17 = vadd.f32 %v2550_v11, %v951_v15  ;;  %v2657_v18 = vpop.f32.mrb[3].mxu0 }
 0x228   : > { %958 = vrot.lane.b32.xlu0 %v3907_v16, %s3389_s17  ;;  %v3910_v19 = vpack.c.bf16 %v952_v17, %v952_v17 }
 0x22c   : > { %1008 = vrot.lane.b32.xlu0 %v3910_v19, %s3389_s17 }
 0x230   : > { %1076 = vrot.lane.b32.xlu0 %v3907_v16, %s3390_s25 }
 0x234   : > { %1180 = vrot.lane.b32.xlu0 %v3907_v16, %s3391_s2 }
 0x238   : > { %1230 = vrot.lane.b32.xlu0 %v3910_v19, %s3391_s2 }
 0x23c   : > { %1178 = vrot.lane.b32.xlu0 %v3907_v16, %s3392_s3 }
 0x240   : > { %1228 = vrot.lane.b32.xlu0 %v3910_v19, %s3392_s3 }
 0x244   : > { %1298 = vrot.lane.b32.xlu0 %v3907_v16, %s3393_s15 }
 0x29a   : > { %v959_v20 = vpop.permute.xlu0 %958 }
 0x29b   : > { %v965_v21 = vsel %vm960_vm3, %v959_v20, 0 }
 0x29c   : > { %2659 = vmatpush3.bf16.xpose.msra.mxu1 %v965_v21 }
 0x29d   : > { %2670 = vmatprep.subr.bf16.mxu1 %v3387_v6 }
 0x29e   : > { %v1009_v22 = vpop.permute.xlu0 %1008 }
 0x29f   : > { %v1014_v23 = vsel %vm960_vm3, %v1009_v22, 0 }
 0x2a0   : > { %2665 = vmatpush3.bf16.xpose.msra.mxu0 %v1014_v23 }
 0x2a1   : > { %2676 = vmatprep.subr.bf16.mxu0 %v3387_v6 }
 0x2a2   : > { %v1077_v24 = vpop.permute.xlu0 %1076 }
 0x2a3   : > { %v1083_v25 = vsel %vm1081_vm4, %v1077_v24, 0  ;;  %2661 = vmatmul.mubr.msk.bf16.vlgmr.msra.gmra.mrb[0].mxu1 %vm960_vm3, %v3907_v16 }
 0x2a4   : > { %2671 = vmatpush3.bf16.msra.mxu1 %v1083_v25  ;;  %2672 = vmatprep.mubr.msk.bf16.mxu1 %vm3388_vm1, %v3387_v6 }
 0x2a5   : > { %2682 = vmatprep.subr.bf16.mxu1 %v3387_v6 }
 0x2a6   : > { %v1181_v36 = vpop.permute.xlu0 %1180 }
 0x2a7   : > { %2667 = vmatmul.mubr.msk.bf16.vlgmr.msra.gmra.mrb[4].mxu0 %vm960_vm3, %v3910_v19  ;;  %v1186_v50 = vsel %vm960_vm3, %v1181_v36, 0 }
 0x2a8   : > { %2678 = vmatprep.mubr.msk.bf16.mxu0 %vm3388_vm1, %v3387_v6 }
 0x2aa   : > { %v1231_v41 = vpop.permute.xlu0 %1230 }
 0x2ab   : > { %v1236_v53 = vsel %vm960_vm3, %v1231_v41, 0 }
 0x2ae   : > { %v1179_v46 = vpop.permute.xlu0 %1178 }
 0x2b2   : > { %v1229_v49 = vpop.permute.xlu0 %1228 }
 0x2b6   : > { %v1299_v54 = vpop.permute.xlu0 %1298 }
 0x2b7   : > { %v1304_v55 = vsel %vm1081_vm4, %v1299_v54, 0 }
 0x376   : > { %v1001_v26 = vpop.f32.mrb[0].mxu1 }
 0x377   : > { %v2662_v27 = vpop.f32.mrb[1].mxu1  ;;  %v1056_v28 = vsel %vm960_vm3, %v1001_v26, -inf }
 0x378   : > { %1057 = vmax.xlane.f32.xlu1 %v1056_v28  ;;  %v1004_v29 = vpop.f32.mrb[2].mxu1 }
 0x379   : > { %v2663_v30 = vpop.f32.mrb[3].mxu1 }
 0x37a   : > { %v1050_v31 = vpop.f32.mrb[4].mxu0 }
 0x37b   : > { %v2668_v32 = vpop.f32.mrb[5].mxu0  ;;  %v1059_v33 = vsel %vm960_vm3, %v1050_v31, -inf }
 0x37c   : > { %1060 = vmax.xlane.f32.xlu1 %v1059_v33  ;;  %v1053_v34 = vpop.f32.mrb[6].mxu0 }
 0x37d   : > { %v2669_v35 = vpop.f32.mrb[7].mxu0 }
 0x38d   : > { %1125 = vrot.lane.b32.xlu1 %v3910_v19, %s3390_s25 }
 0x391   : > { %1346 = vrot.lane.b32.xlu1 %v3910_v19, %s3393_s15 }
 0x405   : > { %v1058_v37 = vpop.xlane.xlu1 %1057 }
 0x406   : > { %v1062_v38 = vsub.f32 %v1001_v26, %v1058_v37 }
 0x408   : > { %v1064_v39 = vmul.f32 1.442695, %v1062_v38 }
 0x409   : > { %v1061_v40 = vpop.xlane.xlu1 %1060 }
 0x40a   : > { %2939 = vpow2.f32 %v1064_v39  ;;  %v1063_v42 = vsub.f32 %v1050_v31, %v1061_v40 }
 0x40c   : > { %v1066_v43 = vmul.f32 1.442695, %v1063_v42 }
 0x40d   : > { %v1126_v44 = vpop.permute.xlu1 %1125 }
 0x40e   : > { %2941 = vpow2.f32 %v1066_v43  ;;  %v1131_v45 = vsel %vm1081_vm4, %v1126_v44, 0 }
 0x40f   : > { %2677 = vmatpush3.bf16.msra.mxu0 %v1131_v45 }
 0x410   : > { %2688 = vmatprep.subr.bf16.mxu0 %v3387_v6 }
 0x411   : > { %v1347_v56 = vpop.permute.xlu1 %1346 }
 0x412   : > { %v1352_v57 = vsel %vm1081_vm4, %v1347_v56, 0 }
 0x414   : > { %v3943_v47 = vpop.eup %2939 }
 0x415   : > { %v1074_v48 = vpack.c.bf16 %v3943_v47, %v3943_v47 }
 0x417   : > { %2673 = vmatmul.mubr.msk.bf16.vlgmr.msra.gmra.mrb[4].mxu1 %vm960_vm3, %v1074_v48 }
 0x418   : > { %v3949_v51 = vpop.eup %2941  ;;  %2683 = vmatpush3.bf16.xpose.msra.mxu1 %v1186_v50  ;;  %2684 = vmatprep.mubr.msk.bf16.mxu1 %vm3388_vm1, %v3387_v6 }
 0x419   : > { %v1075_v52 = vpack.c.bf16 %v3949_v51, %v3949_v51  ;;  %2694 = vmatprep.subr.bf16.mxu1 %v3387_v6 }
 0x41b   : > { %2679 = vmatmul.mubr.msk.bf16.vlgmr.msra.gmra.mrb[8].mxu0 %vm960_vm3, %v1075_v52 }
 0x41c   : > { %2689 = vmatpush3.bf16.xpose.msra.mxu0 %v1236_v53  ;;  %2690 = vmatprep.mubr.msk.bf16.mxu0 %vm3388_vm1, %v3387_v6 }
 0x41d   : > { %2700 = vmatprep.subr.bf16.mxu0 %v3387_v6 }
 0x41f   : > { %2685 = vmatmul.mubr.msk.bf16.vlgmr.msra.gmra.mrb[8].mxu1 %vm960_vm3, %v1179_v46 }
 0x420   : > { %2695 = vmatpush3.bf16.msra.mxu1 %v1304_v55  ;;  %2696 = vmatprep.mubr.msk.bf16.mxu1 %vm3388_vm1, %v3387_v6 }
 0x421   : > { %2706 = vmatprep.subr.bf16.mxu1 %v3387_v6 }
 0x423   : > { %2691 = vmatmul.mubr.msk.bf16.vlgmr.msra.gmra.mrb[12].mxu0 %vm960_vm3, %v1229_v49 }
 0x424   : > { %2701 = vmatpush3.bf16.msra.mxu0 %v1352_v57  ;;  %2702 = vmatprep.mubr.msk.bf16.mxu0 %vm3388_vm1, %v3387_v6 }
 0x425   : > { %2712 = vmatprep.subr.bf16.mxu0 %v3387_v6 }
 0x4ea   : > { %v3971_v58 = vpop.f32.mrb[4].mxu1 }
 0x4eb   : > { %v2674_v59 = vpop.f32.mrb[5].mxu1 }
 0x4ec   : > { %v1122_v60 = vpop.f32.mrb[6].mxu1 }
 0x4ed   : > { %v2675_v61 = vpop.f32.mrb[7].mxu1 }
 0x4ee   : > { %v3973_v62 = vpop.f32.mrb[8].mxu0 }
 0x4ef   : > { %v2680_v63 = vpop.f32.mrb[9].mxu0 }
 0x4f0   : > { %v1170_v0 = vpop.f32.mrb[10].mxu0 }
 0x4f1   : > { %v2681_v1 = vpop.f32.mrb[11].mxu0 }
 0x4f2   : > { %v1222_v2 = vpop.f32.mrb[8].mxu1 }
 0x4f3   : > { %v2686_v3 = vpop.f32.mrb[9].mxu1  ;;  %v1278_v4 = vsel %vm960_vm3, %v1222_v2, -inf }
 0x4f4   : > { %v1225_v5 = vpop.f32.mrb[10].mxu1  ;;  %1279 = vmax.xlane.f32.xlu1 %v1278_v4 }
 0x4f5   : > { %v2687_v7 = vpop.f32.mrb[11].mxu1 }
 0x4f6   : > { %v1272_v10 = vpop.f32.mrb[12].mxu0 }
 0x4f7   : > { %v2692_v11 = vpop.f32.mrb[13].mxu0  ;;  %v1281_v12 = vsel %vm960_vm3, %v1272_v10, -inf }
 0x4f8   : > { %1282 = vmax.xlane.f32.xlu0 %v1281_v12  ;;  %v1275_v13 = vpop.f32.mrb[14].mxu0 }
 0x4f9   : > { %v2693_v14 = vpop.f32.mrb[15].mxu0 }
 0x505   : > { %1401 = vrot.lane.b32.xlu1 %v3907_v16, %s3394_s21 }
 0x509   : > { %1399 = vrot.lane.b32.xlu1 %v3907_v16, %s3395_s18 }
 0x50d   : > { %1567 = vrot.lane.b32.xlu1 %v3910_v19, %s3396_s29 }
 0x50e   : > { %1451 = vrot.lane.b32.xlu0 %v3910_v19, %s3394_s21 }
 0x512   : > { %1449 = vrot.lane.b32.xlu0 %v3910_v19, %s3395_s18 }
 0x516   : > { %1519 = vrot.lane.b32.xlu0 %v3907_v16, %s3396_s29 }
 0x581   : > { %v1280_v15 = vpop.xlane.xlu1 %1279 }
 0x582   : > { %v1284_v17 = vsub.f32 %v1222_v2, %v1280_v15 }
 0x584   : > { %v1286_v18 = vmul.f32 1.442695, %v1284_v17 }
 0x585   : > { %v1283_v20 = vpop.xlane.xlu0 %1282  ;;  %v1402_v25 = vpop.permute.xlu1 %1401 }
 0x586   : > { %2943 = vpow2.f32 %v1286_v18  ;;  %v1285_v21 = vsub.f32 %v1272_v10, %v1283_v20  ;;  %v1407_v28 = vsel %vm960_vm3, %v1402_v25, 0 }
 0x588   : > { %v1288_v22 = vmul.f32 1.442695, %v1285_v21 }
 0x589   : > { %v1452_v23 = vpop.permute.xlu0 %1451  ;;  %v1400_v31 = vpop.permute.xlu1 %1399 }
 0x58a   : > { %2945 = vpow2.f32 %v1288_v22  ;;  %v1457_v32 = vsel %vm960_vm3, %v1452_v23, 0 }
 0x58d   : > { %v1450_v27 = vpop.permute.xlu0 %1449  ;;  %v1568_v35 = vpop.permute.xlu1 %1567 }
 0x58e   : > { %v1573_v36 = vsel %vm1081_vm4, %v1568_v35, 0 }
 0x590   : > { %v3983_v24 = vpop.eup %2943 }
 0x591   : > { %v1296_v26 = vpack.c.bf16 %v3983_v24, %v3983_v24  ;;  %v1520_v33 = vpop.permute.xlu0 %1519 }
 0x592   : > { %v1525_v34 = vsel %vm1081_vm4, %v1520_v33, 0 }
 0x593   : > { %2697 = vmatmul.mubr.msk.bf16.vlgmr.msra.gmra.mrb[12].mxu1 %vm960_vm3, %v1296_v26 }
 0x594   : > { %v3989_v29 = vpop.eup %2945  ;;  %2707 = vmatpush3.bf16.xpose.msra.mxu1 %v1407_v28  ;;  %2708 = vmatprep.mubr.msk.bf16.mxu1 %vm3388_vm1, %v3387_v6 }
 0x595   : > { %v1297_v30 = vpack.c.bf16 %v3989_v29, %v3989_v29  ;;  %2718 = vmatprep.subr.bf16.mxu1 %v3387_v6 }
 0x597   : > { %2703 = vmatmul.mubr.msk.bf16.vlgmr.msra.gmra.mrb[16].mxu0 %vm960_vm3, %v1297_v30 }
 0x598   : > { %2713 = vmatpush3.bf16.xpose.msra.mxu0 %v1457_v32  ;;  %2714 = vmatprep.mubr.msk.bf16.mxu0 %vm3388_vm1, %v3387_v6 }
 0x599   : > { %2724 = vmatprep.subr.bf16.mxu0 %v3387_v6 }
 0x59b   : > { %2709 = vmatmul.mubr.msk.bf16.vlgmr.msra.gmra.mrb[16].mxu1 %vm960_vm3, %v1400_v31 }
 0x59c   : > { %2719 = vmatpush3.bf16.msra.mxu1 %v1525_v34  ;;  %2720 = vmatprep.mubr.msk.bf16.mxu1 %vm3388_vm1, %v3387_v6 }
 0x59d   : > { %2730 = vmatprep.subr.bf16.mxu1 %v3387_v6 }
 0x59f   : > { %2715 = vmatmul.mubr.msk.bf16.vlgmr.msra.gmra.mrb[20].mxu0 %vm960_vm3, %v1450_v27 }
 0x5a0   : > { %2725 = vmatpush3.bf16.msra.mxu0 %v1573_v36  ;;  %2726 = vmatprep.mubr.msk.bf16.mxu0 %vm3388_vm1, %v3387_v6  ;;  %v1290_v36 = vsel %vm960_vm3, %v3983_v24, 0.0 }
 0x5a1   : > { %2736 = vmatprep.subr.bf16.mxu0 %v3387_v6 }
 0x666   : > { %v4011_v37 = vpop.f32.mrb[12].mxu1 }
 0x667   : > { %v2698_v38 = vpop.f32.mrb[13].mxu1 }
 0x668   : > { %v1343_v39 = vpop.f32.mrb[14].mxu1 }
 0x669   : > { %v2699_v40 = vpop.f32.mrb[15].mxu1  ;;  %v1293_v39 = vsel %vm960_vm3, %v3989_v29, 0.0 }
 0x66a   : > { %v4013_v41 = vpop.f32.mrb[16].mxu0 }
 0x66b   : > { %v2704_v42 = vpop.f32.mrb[17].mxu0 }
 0x66c   : > { %v1391_v43 = vpop.f32.mrb[18].mxu0 }
 0x66d   : > { %v2705_v44 = vpop.f32.mrb[19].mxu0 }
 0x66e   : > { %v1443_v45 = vpop.f32.mrb[16].mxu1 }
 0x66f   : > { %v2710_v46 = vpop.f32.mrb[17].mxu1  ;;  %v1499_v48 = vsel %vm960_vm3, %v1443_v45, -inf }
 0x670   : > { %1500 = vmax.xlane.f32.xlu1 %v1499_v48  ;;  %v1446_v49 = vpop.f32.mrb[18].mxu1 }
 0x671   : > { %v2711_v50 = vpop.f32.mrb[19].mxu1 }
 0x672   : > { %v1493_v52 = vpop.f32.mrb[20].mxu0 }
 0x673   : > { %v2716_v53 = vpop.f32.mrb[21].mxu0  ;;  %v1502_v54 = vsel %vm960_vm3, %v1493_v52, -inf }
 0x674   : > { %1503 = vmax.xlane.f32.xlu0 %v1502_v54  ;;  %v1496_v55 = vpop.f32.mrb[22].mxu0  ;;  %v1068_v54 = vsel %vm960_vm3, %v3943_v47, 0.0 }
 0x675   : > { %v2717_v56 = vpop.f32.mrb[23].mxu0 }
 0x681   : > { %1622 = vrot.lane.b32.xlu1 %v3907_v16, %s3397_s14 }
 0x685   : > { %1620 = vrot.lane.b32.xlu1 %v3907_v16, %s3398_s28 }
 0x68a   : > { %1672 = vrot.lane.b32.xlu0 %v3910_v19, %s3397_s14 }
 0x68e   : > { %1670 = vrot.lane.b32.xlu0 %v3910_v19, %s3398_s28 }
 0x6fd   : > { %v1501_v57 = vpop.xlane.xlu1 %1500 }
 0x6fe   : > { %v1505_v59 = vsub.f32 %v1443_v45, %v1501_v57  ;;  %v1071_v57 = vsel %vm960_vm3, %v3949_v51, 0.0 }
 0x700   : > { %v1507_v60 = vmul.f32 1.442695, %v1505_v59 }
 0x701   : > { %v1504_v61 = vpop.xlane.xlu0 %1503  ;;  %v1623_v2 = vpop.permute.xlu1 %1622 }
 0x702   : > { %2947 = vpow2.f32 %v1507_v60  ;;  %v1506_v63 = vsub.f32 %v1493_v52, %v1504_v61  ;;  %v1628_v4 = vsel %vm960_vm3, %v1623_v2, 0 }
 0x704   : > { %v1509_v0 = vmul.f32 1.442695, %v1506_v63 }
 0x705   : > { %v1673_v7 = vpop.permute.xlu0 %1672  ;;  %v1621_v12 = vpop.permute.xlu1 %1620 }
 0x706   : > { %2949 = vpow2.f32 %v1509_v0  ;;  %v1678_v11 = vsel %vm960_vm3, %v1673_v7, 0 }
 0x709   : > { %v1671_v13 = vpop.permute.xlu0 %1670 }
 0x70c   : > { %v2948_v1 = vpop.eup %2947 }
 0x70d   : > { %v1517_v3 = vpack.c.bf16 %v2948_v1, %v2948_v1  ;;  %v1511_v40 = vsel %vm960_vm3, %v2948_v1, 0.0 }
 0x70f   : > { %2721 = vmatmul.mubr.msk.bf16.vlgmr.msra.gmra.mrb[20].mxu1 %vm960_vm3, %v1517_v3 }
 0x710   : > { %v2950_v5 = vpop.eup %2949  ;;  %2731 = vmatpush3.bf16.xpose.msra.mxu1 %v1628_v4  ;;  %2732 = vmatprep.mubr.msk.bf16.mxu1 %vm3388_vm1, %v3387_v6 }
 0x711   : > { %v1518_v10 = vpack.c.bf16 %v2950_v5, %v2950_v5  ;;  %2742 = vmatprep.subr.bf16.mxu1 %v3387_v6  ;;  %v1514_v38 = vsel %vm960_vm3, %v2950_v5, 0.0 }
 0x713   : > { %2727 = vmatmul.mubr.msk.bf16.vlgmr.msra.gmra.mrb[24].mxu0 %vm960_vm3, %v1518_v10 }
 0x714   : > { %2737 = vmatpush3.bf16.xpose.msra.mxu0 %v1678_v11  ;;  %2738 = vmatprep.mubr.msk.bf16.mxu0 %vm3388_vm1, %v3387_v6  ;;  %v2931_v11 = vld [vmem:[%s3868_s4] sm:$0xff]  }
 0x715   : > { %2748 = vmatprep.subr.bf16.mxu0 %v3387_v6 }
 0x717   : > { %2733 = vmatmul.mubr.msk.bf16.vlgmr.msra.gmra.mrb[24].mxu1 %vm960_vm3, %v1621_v12  ;;  %v2932_v12 = vld [vmem:[%s3868_s4 + $0x8] sm:$0xff]   ;;  %s3402_s4 = smov 24  }
 0x718   : > { %2744 = vmatprep.mubr.msk.bf16.mxu1 %vm3388_vm1, %v3387_v6 }
 0x71b   : > { %2739 = vmatmul.mubr.msk.bf16.vlgmr.msra.gmra.mrb[28].mxu0 %vm960_vm3, %v1671_v13 }
 0x71c   : > { %2750 = vmatprep.mubr.msk.bf16.mxu0 %vm3388_vm1, %v3387_v6 }
 0x7e2   : > { %v4037_v14 = vpop.f32.mrb[20].mxu1 }
 0x7e3   : > { %v2722_v15 = vpop.f32.mrb[21].mxu1 }
 0x7e4   : > { %v1564_v17 = vpop.f32.mrb[22].mxu1 }
 0x7e5   : > { %v2723_v18 = vpop.f32.mrb[23].mxu1 }
 0x7e6   : > { %v4039_v20 = vpop.f32.mrb[24].mxu0 }
 0x7e7   : > { %v2728_v21 = vpop.f32.mrb[25].mxu0 }
 0x7e8   : > { %v1612_v22 = vpop.f32.mrb[26].mxu0 }
 0x7e9   : > { %v2729_v23 = vpop.f32.mrb[27].mxu0 }
 0x7ea   : > { %v1664_v25 = vpop.f32.mrb[24].mxu1 }
 0x7eb   : > { %v2734_v26 = vpop.f32.mrb[25].mxu1  ;;  %v1720_v27 = vsel %vm960_vm3, %v1664_v25, -inf }
 0x7ec   : > { %1721 = vmax.xlane.f32.xlu1 %v1720_v27  ;;  %v1667_v28 = vpop.f32.mrb[26].mxu1 }
 0x7ed   : > { %v2735_v30 = vpop.f32.mrb[27].mxu1 }
 0x7ee   : > { %v1714_v31 = vpop.f32.mrb[28].mxu0 }
 0x7ef   : > { %v2740_v32 = vpop.f32.mrb[29].mxu0  ;;  %v1723_v33 = vsel %vm960_vm3, %v1714_v31, -inf }
 0x7f0   : > { %1724 = vmax.xlane.f32.xlu0 %v1723_v33  ;;  %v1717_v34 = vpop.f32.mrb[30].mxu0 }
 0x7f1   : > { %v2741_v35 = vpop.f32.mrb[31].mxu0 }
 0x7fd   : > { %1788 = vrot.lane.b32.xlu1 %v3910_v19, %s3399_s20 }
 0x806   : > { %1740 = vrot.lane.b32.xlu0 %v3907_v16, %s3399_s20 }
 0x821   : > { %1291 = vadd.xlane.f32.xlu1 %v1290_v36 }
 0x825   : > { %1515 = vadd.xlane.f32.xlu1 %v1514_v38  ;;  %1294 = vadd.xlane.f32.xlu0 %v1293_v39 }
 0x829   : > { %1512 = vadd.xlane.f32.xlu0 %v1511_v40 }
 0x879   : > { %v1722_v42 = vpop.xlane.xlu1 %1721 }
 0x87a   : > { %v1726_v43 = vsub.f32 %v1664_v25, %v1722_v42 }
 0x87c   : > { %v1728_v44 = vmul.f32 1.442695, %v1726_v43  ;;  %v2570_v43 = vld [vmem:[%s710_s24] ss:$0 sm:$0xff] }
 0x87d   : > { %v1789_v19 = vpop.permute.xlu1 %1788  ;;  %v1725_v45 = vpop.xlane.xlu0 %1724 }
 0x87e   : > { %2951 = vpow2.f32 %v1728_v44  ;;  %v1794_v16 = vsel %vm1081_vm4, %v1789_v19, 0  ;;  %v1727_v24 = vsub.f32 %v1714_v31, %v1725_v45 }
 0x87f   : > { %2749 = vmatpush3.bf16.msra.mxu0 %v1794_v16 }
 0x880   : > { %v1730_v46 = vmul.f32 1.442695, %v1727_v24  ;;  %2762 = vmatprep.subr.bf16.mxu0 %v3387_v6 }
 0x881   : > { %v1741_v48 = vpop.permute.xlu0 %1740 }
 0x882   : > { %2953 = vpow2.f32 %v1730_v46  ;;  %v1746_v29 = vsel %vm1081_vm4, %v1741_v48, 0 }
 0x883   : > { %2743 = vmatpush3.bf16.msra.mxu1 %v1746_v29 }
 0x884   : > { %2754 = vmatprep.subr.bf16.mxu1 %v3387_v6 }
 0x888   : > { %v2952_v49 = vpop.eup %2951 }
 0x889   : > { %v1732_v50 = vsel %vm960_vm3, %v2952_v49, 0.0  ;;  %v1738_v52 = vpack.c.bf16 %v2952_v49, %v2952_v49 }
 0x88a   : > { %1733 = vadd.xlane.f32.xlu0 %v1732_v50 }
 0x88b   : > { %2745 = vmatmul.mubr.msk.bf16.vlgmr.msra.gmra.mrb[28].mxu1 %vm960_vm3, %v1738_v52 }
 0x88c   : > { %v2954_v53 = vpop.eup %2953  ;;  %2758 = vmatprep.mubr.msk.bf16.mxu1 %vm3388_vm1, %v3387_v6  ;;  %2755 = vmatpush3.bf16.msra.mxu1 %v2931_v11  ;;  %v2574_v11 = vld [vmem:[%s718_s1] ss:$0 sm:$0xff]  ;;  %s4267_s1 = sld [smem:[#allocation22_spill]] }
 0x88d   : > { %v1735_v55 = vsel %vm960_vm3, %v2954_v53, 0.0  ;;  %v1739_v56 = vpack.c.bf16 %v2954_v53, %v2954_v53  ;;  %2756 = vmatprep.subr.bf16.mxu1 %v3387_v6 }
 0x88e   : > { %1069 = vadd.xlane.f32.xlu0 %v1068_v54  ;;  %1736 = vadd.xlane.f32.xlu1 %v1735_v55 }
 0x88f   : > { %2751 = vmatmul.mubr.msk.bf16.vlgmr.msra.gmra.mrb[32].mxu0 %vm960_vm3, %v1739_v56 }
 0x890   : > { %2766 = vmatprep.mubr.msk.bf16.mxu0 %vm3388_vm1, %v3387_v6  ;;  %2757 = vmatpush3.bf16.msra.mxu1 %v2932_v12 }
 0x891   : > { %2770 = vmatprep.subr.bf16.mxu1 %v3387_v6 }
 0x892   : > { %1072 = vadd.xlane.f32.xlu1 %v1071_v57  ;;  %p2588_p11 = scmp.ne.s32.totalorder %s4267_s1, 1 }
 0x893   : > { %vm3404_vm8 = vmmov (!%p2588_p11), 0  }
 0x8ae   : > { %v1292_v59 = vpop.xlane.xlu1 %1291 }
 0x8af   : > { %2955 = vrcp.f32 %v1292_v59 }
 0x8b2   : > { %v1516_v60 = vpop.xlane.xlu1 %1515  ;;  %v1295_v61 = vpop.xlane.xlu0 %1294 }
 0x8b3   : > { %2957 = vrcp.f32 %v1295_v61  ;;  %v2933_v61 = vld [vmem:[%s3873_s26] sm:$0xff]  }
 0x8b4   : > { %2959 = vrcp.f32 %v1516_v60  ;;  %2763 = vmatpush3.bf16.msra.mxu0 %v2933_v61  ;;  %v2587_v61 = vld [vmem:[%s758_s6] ss:$0 sm:$0xff] }
 0x8b5   : > { %2764 = vmatprep.subr.bf16.mxu0 %v3387_v6 }
 0x8b6   : > { %v1513_v47 = vpop.xlane.xlu0 %1512 }
 0x8b7   : > { %2961 = vrcp.f32 %v1513_v47  ;;  %v2934_v47 = vld [vmem:[%s3873_s26 + $0x8] sm:$0xff]   ;;  %s4268_s26 = sld [smem:[#allocation37_spill]] (!%p2588_p11) }
 0x8b8   : > { %2765 = vmatpush3.bf16.msra.mxu0 %v2934_v47 }
 0x8b9   : > { %v2956_v63 = vpop.eup %2955 }
 0x8ba   : > { %v1396_v2 = vmul.f32 %v2956_v63, %v4011_v37  ;;  %v2935_v63 = vld [vmem:[%s3878_s8] sm:$0xff]  }
 0x8bd   : > { %v2958_v0 = vpop.eup %2957 }
 0x8be   : > { %v2960_v1 = vpop.eup %2959  ;;  %v1397_v3 = vmul.f32 %v2958_v0, %v4013_v41  ;;  %v2936_v0 = vld [vmem:[%s3878_s8 + $0x8] sm:$0xff]  }
 0x8bf   : > { %v1618_v7 = vmul.f32 %v2960_v1, %v4039_v20 }
 0x8c0   : > { %v1398_v51 = vpack.c.bf16 %v1397_v3, %v1396_v2 }
 0x8c1   : > { %v2962_v4 = vpop.eup %2961 }
 0x8c2   : > { %v1617_v5 = vmul.f32 %v2962_v4, %v4037_v14  ;;  %1842 = vrot.lane.b32.xlu0 %v1398_v51, %s3400_s19 }
 0x8c4   : > { %v1619_v10 = vpack.c.bf16 %v1618_v7, %v1617_v5 }
 0x8c6   : > { %1845 = vrot.lane.b32.xlu1 %v1619_v10, %s3401_s10 }
 0x917   : > { %v1734_v37 = vpop.xlane.xlu0 %1733 }
 0x91b   : > { %v1737_v41 = vpop.xlane.xlu1 %1736  ;;  %v1070_v13 = vpop.xlane.xlu0 %1069 }
 0x91c   : > { %2963 = vrcp.f32 %v1070_v13  ;;  %v2575_v13 = vld [vmem:[%s726_s5] ss:$0 sm:$0xff] }
 0x91f   : > { %v1073_v14 = vpop.xlane.xlu1 %1072 }
 0x920   : > { %2965 = vrcp.f32 %v1073_v14 }
 0x921   : > { %2967 = vrcp.f32 %v1734_v37 }
 0x922   : > { %2969 = vrcp.f32 %v1737_v41 }
 0x926   : > { %v2964_v15 = vpop.eup %2963 }
 0x927   : > { %v1175_v18 = vmul.f32 %v2964_v15, %v3971_v58 }
 0x92a   : > { %v2966_v17 = vpop.eup %2965 }
 0x92b   : > { %v1176_v20 = vmul.f32 %v2966_v17, %v3973_v62  ;;  %v2968_v26 = vpop.eup %2967 }
 0x92c   : > { %v2970_v28 = vpop.eup %2969 }
 0x92d   : > { %v1177_v21 = vpack.c.bf16 %v1176_v20, %v1175_v18  ;;  %v2937_v20 = vld [vmem:[%s3878_s8 + $0x10] sm:$0xff]  }
 0x934   : > { %v1843_v58 = vpop.permute.xlu0 %1842 }
 0x935   : > { %v1852_v38 = vsel %vm960_vm3, %v1177_v21, %v1843_v58  ;;  %v2938_v21 = vld [vmem:[%s3878_s8 + $0x18] sm:$0xff]  }
 0x938   : > { %v1846_v62 = vpop.permute.xlu1 %1845 }
 0x939   : > { %v1855_v39 = vsel %vm1853_vm5, %v1852_v38, %v1846_v62 }
 0x95e   : > { %v1782_v22 = vpop.f32.mrb[28].mxu1 }
 0x95f   : > { %v2746_v23 = vpop.f32.mrb[29].mxu1  ;;  %v1838_v31 = vmul.f32 %v2968_v26, %v1782_v22  ;;  %v2576_v22 = vld [vmem:[%s734_s23] ss:$0 sm:$0xff] }
 0x960   : > { %v1785_v25 = vpop.f32.mrb[30].mxu1 }
 0x961   : > { %v2747_v27 = vpop.f32.mrb[31].mxu1 }
 0x962   : > { %v1830_v30 = vpop.f32.mrb[32].mxu0 }
 0x963   : > { %v1839_v32 = vmul.f32 %v2970_v28, %v1830_v30  ;;  %v2752_v33 = vpop.f32.mrb[33].mxu0 }
 0x964   : > { %v1833_v34 = vpop.f32.mrb[34].mxu0 }
 0x965   : > { %v1840_v35 = vpack.c.bf16 %v1839_v32, %v1838_v31  ;;  %v2753_v36 = vpop.f32.mrb[35].mxu0  ;;  %v2580_v34 = vld [vmem:[%s742_s30] ss:$0 sm:$0xff]  ;;  %s4269_s30 = smov (!%p2588_p11), %s4268_s26 }
 0x967   : > { %1848 = vrot.lane.b32.xlu1 %v1840_v35, %s3402_s4 }
 0x9d9   : > { %v1849_v40 = vpop.permute.xlu1 %1848 }
 0x9da   : > { %v1858_v42 = vsel %vm1856_vm6, %v1855_v39, %v1849_v40 }
 0x9db   : > { %2759 = vmatmul.mubr.msk.bf16.vlgmr.msra.gmra.mrb[32].mxu1 %vm910_vm2, %v1858_v42 }
 0x9dc   : > { %2778 = vmatprep.mubr.msk.bf16.mxu1 %vm3388_vm1, %v3387_v6  ;;  %2771 = vmatpush3.bf16.msra.mxu1 %v2935_v63 }
 0x9dd   : > { %2772 = vmatprep.subr.bf16.mxu1 %v3387_v6 }
 0x9e0   : > { %2773 = vmatpush3.bf16.msra.mxu1 %v2936_v0 }
 0x9e1   : > { %2774 = vmatprep.subr.bf16.mxu1 %v3387_v6 }
 0x9e4   : > { %2775 = vmatpush3.bf16.msra.mxu1 %v2937_v20 }
 0x9e5   : > { %2776 = vmatprep.subr.bf16.mxu1 %v3387_v6 }
 0x9e8   : > { %2777 = vmatpush3.bf16.msra.mxu1 %v2938_v21 }
 0xaae   : > { %v1918_v44 = vpop.f32.mrb[32].mxu1 }
 0xaaf   : > { %v1919_v19 = vadd.f32 %v2570_v43, %v1918_v44  ;;  %v2760_v45 = vpop.f32.mrb[33].mxu1 }
 0xab0   : > { %v1921_v16 = vpop.f32.mrb[34].mxu1 }
 0xab1   : > { %v1922_v24 = vadd.f32 %v2570_v43, %v1921_v16  ;;  %v2761_v46 = vpop.f32.mrb[35].mxu1  ;;  %v1925_v48 = vadd.f32 %v1919_v19, %v3892_v8 }
 0xab3   : > { %v1929_v29 = vsel %vm910_vm2, %v1925_v48, 0.0  ;;  %v1926_v49 = vadd.f32 %v1922_v24, %v3894_v9 }
 0xab4   : > { %1930 = vadd.xlane.f32.xlu0 %v1929_v29 }
 0xab5   : > { %v1932_v50 = vsel %vm910_vm2, %v1926_v49, 0.0 }
 0xab6   : > { %1933 = vadd.xlane.f32.xlu1 %v1932_v50 }
 0xb41   : > { %v1931_v52 = vpop.xlane.xlu0 %1930 }
 0xb42   : > { %v1936_v53 = vmul.f32 0.03125, %v1931_v52 }
 0xb43   : > { %v1934_v54 = vpop.xlane.xlu1 %1933 }
 0xb44   : > { %v1938_v55 = vsub.f32 %v1925_v48, %v1936_v53  ;;  %v1937_v56 = vmul.f32 0.03125, %v1934_v54 }
 0xb46   : > { %v1939_v57 = vsub.f32 %v1926_v49, %v1937_v56  ;;  %v1940_v59 = vmul.f32 %v1938_v55, %v1938_v55 }
 0xb48   : > { %v1942_v8 = vsel %vm910_vm2, %v1940_v59, 0.0  ;;  %v1941_v60 = vmul.f32 %v1939_v57, %v1939_v57 }
 0xb49   : > { %1943 = vadd.xlane.f32.xlu0 %v1942_v8  ;;  %v2586_v8 = vld [vmem:[%s750_s0] ss:$0 sm:$0xff]  ;;  %s4270_s0 = sld [smem:[#allocation38_spill]] (!%p2588_p11) }
 0xb4a   : > { %v1945_v9 = vsel %vm910_vm2, %v1941_v60, 0.0 }
 0xb4d   : > { %1946 = vadd.xlane.f32.xlu0 %v1945_v9 }
 0xbd6   : > { %v1944_v1 = vpop.xlane.xlu0 %1943 }
 0xbd7   : > { %v1948_v2 = vmul.f32 0.03125, %v1944_v1 }
 0xbd9   : > { %v1950_v3 = vadd.f32 1e-05, %v1948_v2 }
 0xbda   : > { %v1947_v4 = vpop.xlane.xlu0 %1946 }
 0xbdb   : > { %2971 = vrsqrt.f32 %v1950_v3  ;;  %v1949_v51 = vmul.f32 0.03125, %v1947_v4  ;;  %v2979_v3 = vld [vmem:[%s4268_s26] sm:$0xff] (!%p2588_p11)   ;;  %v3403_v4 = vmov (!%p2588_p11), 0.0  }
 0xbdc   : > { %2782 = vmatprep.subr.bf16.mxu0 (!%p2588_p11), %v3403_v4 }
 0xbdd   : > { %v1951_v5 = vadd.f32 1e-05, %v1949_v51  ;;  %v2980_v51 = vld [vmem:[%s4269_s30 + $0x8] sm:$0xff] (!%p2588_p11)  }
 0xbdf   : > { %2973 = vrsqrt.f32 %v1951_v5 }
 0xbe5   : > { %v2972_v7 = vpop.eup %2971 }
 0xbe6   : > { %v1954_v10 = vmul.f32 %v2972_v7, %v1938_v55  ;;  %v2589_v7 = vld [vmem:[%s4270_s0] ss:$0 sm:$0xff] (!%p2588_p11) }
 0xbe8   : > { %v1962_v37 = vmul.f32 %v2574_v11, %v1954_v10 }
 0xbe9   : > { %v2974_v12 = vpop.eup %2973 }
 0xbea   : > { %v1955_v41 = vmul.f32 %v2974_v12, %v1939_v57  ;;  %v1970_v15 = vadd.f32 %v2575_v13, %v1962_v37 }
 0xbec   : > { %v1963_v14 = vmul.f32 %v2574_v11, %v1955_v41 }
 0xbee   : > { %v1971_v17 = vadd.f32 %v2575_v13, %v1963_v14 }
 0xbf0   : > { %v1972_v18 = vpack.c.bf16 %v1971_v17, %v1970_v15 }
 0xbf2   : > { %2767 = vmatmul.mubr.msk.bf16.vlgmr.msra.gmra.mrb[36].mxu0 %vm910_vm2, %v1972_v18 }
 0xbf3   : > { %2783 = vmatpush3.bf16.msra.mxu0 (!%p2588_p11), %v2979_v3  ;;  %2786 = vmatprep.mubr.msk.bf16.mxu0 (!%p2588_p11), %vm3404_vm8, %v3403_v4 }
 0xbf4   : > { %2784 = vmatprep.subr.bf16.mxu0 (!%p2588_p11), %v3403_v4 }
 0xbf7   : > { %2785 = vmatpush3.bf16.msra.mxu0 (!%p2588_p11), %v2980_v51 }
 0xcc5   : > { %v2033_v23 = vpop.f32.mrb[36].mxu0 }
 0xcc6   : > { %v2034_v25 = vadd.f32 %v2576_v22, %v2033_v23  ;;  %v2768_v26 = vpop.f32.mrb[37].mxu0 }
 0xcc7   : > { %v2036_v27 = vpop.f32.mrb[38].mxu0 }
 0xcc8   : > { %v2037_v28 = vadd.f32 %v2576_v22, %v2036_v27  ;;  %v2769_v30 = vpop.f32.mrb[39].mxu0  ;;  %v2040_v31 = vmax.f32 %v2034_v25, 0.0 }
 0xcca   : > { %v2041_v32 = vmax.f32 %v2037_v28, 0.0 }
 0xccc   : > { %v2042_v33 = vpack.c.bf16 %v2041_v32, %v2040_v31 }
 0xcce   : > { %2779 = vmatmul.mubr.msk.bf16.vlgmr.msra.gmra.mrb[36].mxu1 %vm2082_vm7, %v2042_v33 }
 0xda1   : > { %v2120_v35 = vpop.f32.mrb[36].mxu1 }
 0xda2   : > { %v2121_v36 = vadd.f32 %v2580_v34, %v2120_v35  ;;  %v2780_v6 = vpop.f32.mrb[37].mxu1 }
 0xda3   : > { %v2123_v58 = vpop.f32.mrb[38].mxu1 }
 0xda4   : > { %v2124_v62 = vadd.f32 %v2580_v34, %v2123_v58  ;;  %v2781_v38 = vpop.f32.mrb[39].mxu1  ;;  %v2127_v39 = vadd.f32 %v2121_v36, %v1970_v15 }
 0xda6   : > { %v2131_v40 = vsel %vm910_vm2, %v2127_v39, 0.0  ;;  %v2128_v42 = vadd.f32 %v2124_v62, %v1971_v17 }
 0xda7   : > { %2132 = vadd.xlane.f32.xlu1 %v2131_v40 }
 0xda8   : > { %v2134_v43 = vsel %vm910_vm2, %v2128_v42, 0.0 }
 0xda9   : > { %2135 = vadd.xlane.f32.xlu0 %v2134_v43 }
 0xe34   : > { %v2133_v44 = vpop.xlane.xlu1 %2132 }
 0xe35   : > { %v2137_v19 = vmul.f32 0.03125, %v2133_v44 }
 0xe36   : > { %v2136_v45 = vpop.xlane.xlu0 %2135 }
 0xe37   : > { %v2139_v16 = vsub.f32 %v2127_v39, %v2137_v19  ;;  %v2138_v24 = vmul.f32 0.03125, %v2136_v45 }
 0xe39   : > { %v2140_v46 = vsub.f32 %v2128_v42, %v2138_v24  ;;  %v2141_v48 = vmul.f32 %v2139_v16, %v2139_v16 }
 0xe3b   : > { %v2143_v29 = vsel %vm910_vm2, %v2141_v48, 0.0  ;;  %v2142_v49 = vmul.f32 %v2140_v46, %v2140_v46 }
 0xe3c   : > { %2144 = vadd.xlane.f32.xlu1 %v2143_v29 }
 0xe3d   : > { %v2146_v50 = vsel %vm910_vm2, %v2142_v49, 0.0 }
 0xe3e   : > { %2147 = vadd.xlane.f32.xlu0 %v2146_v50 }
 0xec9   : > { %v2145_v52 = vpop.xlane.xlu1 %2144 }
 0xeca   : > { %v2149_v53 = vmul.f32 0.03125, %v2145_v52 }
 0xecb   : > { %v2148_v54 = vpop.xlane.xlu0 %2147 }
 0xecc   : > { %v2151_v55 = vadd.f32 1e-05, %v2149_v53  ;;  %v2150_v56 = vmul.f32 0.03125, %v2148_v54 }
 0xece   : > { %2975 = vrsqrt.f32 %v2151_v55  ;;  %v2152_v57 = vadd.f32 1e-05, %v2150_v56 }
 0xed0   : > { %2977 = vrsqrt.f32 %v2152_v57 }
 0xed8   : > { %v2976_v59 = vpop.eup %2975 }
 0xed9   : > { %v2155_v60 = vmul.f32 %v2976_v59, %v2139_v16 }
 0xeda   : > { %v2978_v9 = vpop.eup %2977 }
 0xedb   : > { %v2163_v47 = vmul.f32 %v2586_v8, %v2155_v60  ;;  %v2156_v63 = vmul.f32 %v2978_v9, %v2140_v46  ;;  %2178 = sbr.rel (%p2588_p11) target bundleno = 4342 (0x10f6), region = 132 }
 0xedd   : > { %v2171_v0 = vadd.f32 %v2587_v61, %v2163_v47  ;;  %v2164_v1 = vmul.f32 %v2586_v8, %v2156_v63 }
 0xedf   : > { %2173 = vst.msk [vmem:[#allocation2] sm:$0xff] %vm910_vm2, %v2171_v0  ;;  %v2172_v2 = vadd.f32 %v2587_v61, %v2164_v1 }
 0xee1   : > { %2174 = vst.msk [vmem:[#allocation2 + $0x8] sm:$0xff] %vm910_vm2, %v2172_v2  ;;  %v2179_v5 = vpack.c.bf16 (!%p2588_p11), %v2172_v2, %v2171_v0 }
 0xee3   : > { %2787 = vmatmul.mubr.msk.bf16.vlgmr.msra.gmra.mrb[0].mxu0 %vm910_vm2, %v2179_v5 }
 0xfb6   : > { %v2240_v10 = vpop.f32.mrb[0].mxu0 }
 0xfb7   : > { %v2241_v11 = vadd.f32 %v2589_v7, %v2240_v10  ;;  %v2788_v12 = vpop.f32.mrb[1].mxu0 }
 0xfb8   : > { %v2243_v37 = vpop.f32.mrb[2].mxu0 }
 0xfb9   : > { %2247 = vmax.xlane.f32.xlu0 %v2241_v11  ;;  %v2789_v41 = vpop.f32.mrb[3].mxu0  ;;  %v2244_v13 = vadd.f32 %v2589_v7, %v2243_v37 }
 0xfbd   : > { %2249 = vmax.xlane.f32.xlu0 %v2244_v13 }
0x1046   : > { %v2248_v14 = vpop.xlane.xlu0 %2247 }
0x1047   : > { %v2251_v15 = vsub.f32 %v2241_v11, %v2248_v14 }
0x1049   : > { %v2253_v17 = vmul.f32 1.442695, %v2251_v15 }
0x104a   : > { %v2250_v18 = vpop.xlane.xlu0 %2249 }
0x104b   : > { %2981 = vpow2.f32 %v2253_v17  ;;  %v2252_v20 = vsub.f32 %v2244_v13, %v2250_v18 }
0x104d   : > { %v2255_v21 = vmul.f32 1.442695, %v2252_v20 }
0x104f   : > { %2983 = vpow2.f32 %v2255_v21 }
0x1055   : > { %v2982_v22 = vpop.eup %2981 }
0x1056   : > { %2257 = vadd.xlane.f32.xlu1 %v2982_v22 }
0x1059   : > { %v2984_v23 = vpop.eup %2983 }
0x105a   : > { %2259 = vadd.xlane.f32.xlu1 %v2984_v23 }
0x10e3   : > { %v2258_v25 = vpop.xlane.xlu1 %2257 }
0x10e4   : > { %2985 = vrcp.f32 %v2258_v25 }
0x10e7   : > { %v2260_v26 = vpop.xlane.xlu1 %2259 }
0x10e8   : > { %2987 = vrcp.f32 %v2260_v26 }
0x10ee   : > { %v2986_v27 = vpop.eup %2985 }
0x10ef   : > { %v2262_v28 = vmul.f32 %v2986_v27, %v2982_v22 }
0x10f1   : > { %2265 = vst [vmem:[#allocation16] sm:$0xff] %v2262_v28 }
0x10f2   : > { %v2988_v30 = vpop.eup %2987 }
0x10f3   : > { %v2264_v31 = vmul.f32 %v2988_v30, %v2984_v23 }
0x10f5   : > { %2266 = vst [vmem:[#allocation16 + $0x8] sm:$0xff] %v2264_v31 }
0x10f6 PF: > { %p2855_p0 = scmp.eq.s32.totalorder %s3521_s27, 1  ;;  %s3405_s17 = smov [#allocation16]  }
0x10f7   : > { %s2276_s25 = sshll.u32 %s3405_s17, 4  ;;  %s2277_s25 = int_to_ptr.vmem [resolvable:$true] %s2276_s25 }
0x10f8   : > { %s3285_s2 = scalar_lea.vmem %s2277_s25, 256  ;;  %p3292_p8 = scmp.lt.s32.totalorder %s2277_s25, %s2277_s25 }
0x10f9   : > { %p3286_p5 = scmp.ne.s32.totalorder %s2277_s25, %s3285_s2  ;;  %p3293_p3 = scmp.lt.s32.totalorder %s3285_s2, %s3285_s2 }
0x10fb   : > { %p3287_p2 = pnand %p3286_p5, %p2855_p0  ;;  %p3294_p10 = por %p3293_p3, %p3292_p8 }
0x10fd   : > { %p3288_p1 = pneg %p3287_p2 }
0x10ff   : > { %p3295_p13 = pnand %p3294_p10, %p3288_p1 }
0x1101   : > { %3298 = shalt.err (!%p3295_p13)
}
0x1102   : > { %s4271_s21 = sld [smem:[#allocation39_spill]] }
0x1108   : > { %s4272_s18 = smov %s4271_s21  ;;  %s3299_s29 = scalar_lea.hbm %s4271_s21, 256 }
0x1109   : > { %p3300_p6 = scmp.ne.s32.totalorder %s4272_s18, %s3299_s29  ;;  %p3305_p7 = scmp.lt.u32.totalorder %s3299_s29, %s4272_s18 }
0x110b   : > { %p3301_p4 = pnand %p3300_p6, %p2855_p0 }
0x110d   : > { %p3302_p12 = pneg %p3301_p4 }
0x110f   : > { %p3307_p9 = pnand %p3305_p7, %p3302_p12 }
0x1111   : > { %3310 = shalt.err (!%p3307_p9)
}
0x1112   : > { %s3406_s4 = smov 128  }
0x1113   : > { %2815 = dma.vmem_to_hbm [thread:$0]  (%p2855_p0), %s2277_s25, 256, %s4272_s18, [#allocation5], %s3406_s4, %s3406_s4, %s3400_s19  }
0x1114   : > { %3348 = dma.done.wait (%p2855_p0), [#allocation5], 256  }
0x1115   : > { %3350 = vsyncadd (%p2855_p0), [#allocation5], 4294967040 }
0x1116 PF: > { %s4273_s8 = sld [smem:[#allocation24_spill]]  ;;  %s4274_s6 = sld [smem:[#allocation21_spill]] }
0x1117   : > { %s4275_s23 = sld [smem:[#allocation27_spill]]  ;;  %s4276_s24 = sld [smem:[#allocation23_spill]] }
0x1118   : > { %s4277_s25 = sld [smem:[#allocation25_spill]]  ;;  %s4278_s21 = smov %s3357_s22 }
0x111c   : > { %s29_s26 = sadd.s32 1, %s4273_s8   ;;  %s4279_s22 = smov %s4274_s6 }
0x111d   : > { %p26_p11 = scmp.ge.s32.totalorder %s29_s26, 4  }
0x111f   :  { %28 = sbr.rel (!%p26_p11) target bundleno = 18 (0x12), region = 227 }
0x1126   :  { %2292 = vsyncpa [#allocation4], 1 }
0x1127   :  { %2294 = vsyncpa [#allocation4 + $0x1], 1 }
0x1128   :  { %2295 = vsyncpa [#allocation7], 1 }
0x1129   :  { %2296 = vsyncpa [#allocation5], 1 }
0x112a   :  { %2298 = vsyncpa [#allocation5 + $0x1], 1 }

</bundles_post_ra>
